<compile_context>
chip_gen: v7x
topology: tpu7x:2x2x1
jax: 0.10.0
libtpu: 0.0.40
codegen_flags: <defaults>
</compile_context>

<pallas_src>
import functools

import jax
import jax.numpy as jnp
from jax.experimental import pallas as pl
from jax.experimental.pallas import tpu as pltpu


def _layernorm(x, gamma, beta, eps):
    mu = jnp.mean(x, axis=-1, keepdims=True)
    xc = x - mu
    var = jnp.mean(xc * xc, axis=-1, keepdims=True)
    return xc * jax.lax.rsqrt(var + eps) * gamma + beta


def _transformer_kernel(x_ref, lng_ref, lnb_ref, wqkv_ref, wo_ref, bo_ref,
                        w1_ref, b1_ref, w2_ref, b2_ref, o_ref,
                        x_acc, vo_acc, *, heads, dim_head, tb, n, scale, eps,
                        compute_dtype, approx_recip):
    f32 = jnp.float32
    cdt = compute_dtype
    H, dh = heads, dim_head
    hd = H * dh
    layer = pl.program_id(1)

    @pl.when(layer == 0)
    def _():
        x_acc[...] = x_ref[...].astype(f32)

    x = x_acc[...]                                    # (M, D) f32, M = tb*n

    lg = lng_ref[0]                                   # (2, D) LayerNorm gammas
    lb = lnb_ref[0]                                   # (2, D) LayerNorm betas

    # ---- PreNorm -> multi-head self-attention -> residual -----------------
    xn = _layernorm(x, lg[0:1, :], lb[0:1, :], eps).astype(cdt)
    # One fused QKV projection: (M, D) @ (D, 3*H*dh), f32 accumulation.
    qkv = jnp.dot(xn, wqkv_ref[0], preferred_element_type=f32)

    # Per-head softmax(q k^T) v, batched over the TB sequences of this block.
    # TODO(synk): for long sequences, replace the static head unroll with
    # lax.fori_loop + KV-tiled online softmax instead of full (N, N) scores.
    for h in range(H):                                # static unroll (H small)
        q = qkv[:, h * dh:(h + 1) * dh].reshape(tb, n, dh)
        k = qkv[:, hd + h * dh:hd + (h + 1) * dh].reshape(tb, n, dh)
        v = qkv[:, 2 * hd + h * dh:2 * hd + (h + 1) * dh].reshape(tb, n, dh)
        s = jnp.einsum('bnd,bmd->bnm', q.astype(cdt), k.astype(cdt),
                       preferred_element_type=f32) * scale
        s = s - jnp.max(s, axis=-1, keepdims=True)
        p = jnp.exp(s)
        denom = jnp.sum(p, axis=-1, keepdims=True)
        if approx_recip:
            attn = p * pl.reciprocal(denom, approx=True)   # EUP slot, ~free
        else:
            attn = p / denom                               # exact (strict f32)
        oh = jnp.einsum('bnm,bmd->bnd', attn.astype(cdt), v.astype(cdt),
                        preferred_element_type=f32)
        # Lay the heads side by side -> single wide Wo matmul below.
        vo_acc[:, h * dh:(h + 1) * dh] = oh.reshape(tb * n, dh)

    proj = jnp.dot(vo_acc[...].astype(cdt), wo_ref[0],
                   preferred_element_type=f32) + bo_ref[0]
    x = x + proj

    # ---- PreNorm -> FeedForward (Linear -> SiLU -> Linear) -> residual ----
    xn2 = _layernorm(x, lg[1:2, :], lb[1:2, :], eps).astype(cdt)
    h1 = jnp.dot(xn2, w1_ref[0], preferred_element_type=f32) + b1_ref[0]
    h1 = h1 * jax.nn.sigmoid(h1)                      # SiLU, f32 on the EUP
    y = jnp.dot(h1.astype(cdt), w2_ref[0], preferred_element_type=f32) + b2_ref[0]
    x = x + y

    x_acc[...] = x                                    # carry to next layer

    @pl.when(layer == pl.num_programs(1) - 1)
    def _():
        # Single contiguous (TB*N, D) slab store.
        # TODO(synk): if D stays < 128 in production, reshape the output to a
        # lane-dense (BP, N*D) slab in the wrapper for unmasked stores.
        o_ref[...] = x.astype(o_ref.dtype)


def transformer_forward(x, params, *, heads, dim_head, eps=1e-5,
                        compute_dtype=jnp.float32, seq_block=None):
    """x: (B, P, N, dim) -> (B, P, N, dim).

    params = (lng, lnb, wqkv, wo, bo, w1, b1, w2, b2):
      lng/lnb: (depth, 2, dim)         LayerNorm gamma/beta (attn, ff)
      wqkv:    (depth, dim, 3*H*dh)    to_qkv.weight^T (bias=False)
      wo:      (depth, H*dh, dim)      to_out[0].weight^T
      bo:      (depth, 1, dim)         to_out[0].bias
      w1/b1:   (depth, dim, mlp) / (depth, 1, mlp)
      w2/b2:   (depth, mlp, dim) / (depth, 1, dim)
    """
    (lng, lnb, wqkv, wo, bo, w1, b1, w2, b2) = params
    B, P, N, D = x.shape
    depth = lng.shape[0]
    H, dh = heads, dim_head
    BP = B * P

    if seq_block is None:
        # Keep >= 2 grid steps on the parallel axis (v7x has 2 TensorCores).
        seq_block = BP // 2 if (BP % 2 == 0 and BP >= 2) else BP
    assert BP % seq_block == 0, (BP, seq_block)
    nb = BP // seq_block
    M = seq_block * N                                  # rows per grid step

    x_flat = x.reshape(BP * N, D)

    cdt = compute_dtype
    # Cast matmul weights once in the wrapper (halves DMA/VMEM in bf16 mode).
    wqkv_c, wo_c, w1_c, w2_c = (w.astype(cdt) for w in (wqkv, wo, w1, w2))

    kernel = functools.partial(
        _transformer_kernel, heads=H, dim_head=dh, tb=seq_block, n=N,
        scale=float(dh) ** -0.5, eps=eps, compute_dtype=cdt,
        approx_recip=(cdt != jnp.float32))

    def layer_spec(arr):
        # One layer's slice per "arbitrary" grid step (layer streaming).
        zeros = (0,) * (arr.ndim - 1)
        return pl.BlockSpec((1,) + arr.shape[1:], lambda i, l: (l,) + zeros)

    act_spec = pl.BlockSpec((M, D), lambda i, l: (i, 0))

    out = pl.pallas_call(
        kernel,
        out_shape=jax.ShapeDtypeStruct((BP * N, D), x.dtype),
        grid_spec=pltpu.PrefetchScalarGridSpec(
            num_scalar_prefetch=0,
            grid=(nb, depth),
            in_specs=[
                act_spec,                               # activations
                layer_spec(lng), layer_spec(lnb),       # LayerNorm params
                layer_spec(wqkv_c), layer_spec(wo_c), layer_spec(bo),
                layer_spec(w1_c), layer_spec(b1),
                layer_spec(w2_c), layer_spec(b2),
            ],
            out_specs=act_spec,
            scratch_shapes=[
                pltpu.VMEM((M, D), jnp.float32),        # activation carry
                pltpu.VMEM((M, H * dh), jnp.float32),   # concatenated head outs
            ],
        ),
        compiler_params=pltpu.CompilerParams(
            dimension_semantics=("parallel", "arbitrary"),
            vmem_limit_bytes=48 * 1024 * 1024),
    )(x_flat, lng, lnb, wqkv_c, wo_c, bo, w1_c, b1, w2_c, b2)

    return out.reshape(B, P, N, D)


def transformer_reference(x, params, *, heads, dim_head, eps=1e-5,
                          compute_dtype=jnp.float32):
    """Independent pure-JAX reference of the intended transformer math."""
    (lng, lnb, wqkv, wo, bo, w1, b1, w2, b2) = params
    depth = lng.shape[0]
    H, dh = heads, dim_head
    scale = float(dh) ** -0.5
    f32 = jnp.float32
    cdt = compute_dtype
    hp = jax.lax.Precision.HIGHEST
    B, P, N, D = x.shape
    h = x.reshape(B * P, N, D).astype(f32)

    def ln(t, g, b):
        mu = jnp.mean(t, -1, keepdims=True)
        var = jnp.mean((t - mu) ** 2, -1, keepdims=True)
        return (t - mu) * jax.lax.rsqrt(var + eps) * g + b

    def mm(a, b):
        return jnp.einsum('...ij,jk->...ik', a.astype(cdt), b.astype(cdt),
                          precision=hp, preferred_element_type=f32)

    for l in range(depth):
        xn = ln(h, lng[l, 0], lnb[l, 0])
        qkv = mm(xn, wqkv[l])                                 # (BP, N, 3*H*dh)
        q, k, v = jnp.split(qkv, 3, axis=-1)

        def heads_first(t):
            return t.reshape(t.shape[0], N, H, dh).transpose(0, 2, 1, 3)

        q, k, v = heads_first(q), heads_first(k), heads_first(v)
        dots = jnp.einsum('bhne,bhme->bhnm', q.astype(cdt), k.astype(cdt),
                          precision=hp, preferred_element_type=f32) * scale
        attn = jax.nn.softmax(dots, axis=-1)
        oh = jnp.einsum('bhnm,bhme->bhne', attn.astype(cdt), v.astype(cdt),
                        precision=hp, preferred_element_type=f32)
        oh = oh.transpose(0, 2, 1, 3).reshape(h.shape[0], N, H * dh)
        h = h + mm(oh, wo[l]) + bo[l]

        xn = ln(h, lng[l, 1], lnb[l, 1])
        f = mm(xn, w1[l]) + b1[l]
        f = f * jax.nn.sigmoid(f)
        h = h + mm(f, w2[l]) + b2[l]
    return h.reshape(B, P, N, D)


if __name__ == "__main__":
    # Transformer(dim=32, depth=2, heads=4, dim_head=8, mlp_dim=64)
    # input x: (batch=2, patches=2, tokens=8, dim=32)
    B, P, N = 2, 2, 8
    dim, depth, heads, dim_head, mlp_dim = 32, 2, 4, 8, 64
    inner = heads * dim_head

    key = jax.random.PRNGKey(0)
    ks = jax.random.split(key, 10)
    s = 0.2
    lng = 1.0 + 0.1 * jax.random.normal(ks[0], (depth, 2, dim), jnp.float32)
    lnb = 0.1 * jax.random.normal(ks[1], (depth, 2, dim), jnp.float32)
    wqkv = s * jax.random.normal(ks[2], (depth, dim, 3 * inner), jnp.float32)
    wo = s * jax.random.normal(ks[3], (depth, inner, dim), jnp.float32)
    bo = 0.1 * jax.random.normal(ks[4], (depth, 1, dim), jnp.float32)
    w1 = s * jax.random.normal(ks[5], (depth, dim, mlp_dim), jnp.float32)
    b1 = 0.1 * jax.random.normal(ks[6], (depth, 1, mlp_dim), jnp.float32)
    w2 = s * jax.random.normal(ks[7], (depth, mlp_dim, dim), jnp.float32)
    b2 = 0.1 * jax.random.normal(ks[8], (depth, 1, dim), jnp.float32)
    params = (lng, lnb, wqkv, wo, bo, w1, b1, w2, b2)

    x = jax.random.normal(ks[9], (B, P, N, dim), jnp.float32)

    # --- Strict path: f32 matmul operands ------------------------------------
    out_f32 = jax.block_until_ready(
        transformer_forward(x, params, heads=heads, dim_head=dim_head,
                            compute_dtype=jnp.float32))
    ref_f32 = transformer_reference(x, params, heads=heads, dim_head=dim_head,
                                    compute_dtype=jnp.float32)
    assert out_f32.shape == (B, P, N, dim), out_f32.shape
    err_f32 = float(jnp.max(jnp.abs(out_f32 - ref_f32)))
    # Tolerance is deliberately generous to stay robust to the backend's
    # default f32 matmul-pass precision; observed error is far smaller.
    assert err_f32 < 5e-2, f"f32 path mismatch vs reference: {err_f32}"

    # --- Performance path: bf16 matmul operands (f32 accumulation) -----------
    out_bf16 = jax.block_until_ready(
        transformer_forward(x, params, heads=heads, dim_head=dim_head,
                            compute_dtype=jnp.bfloat16))
    ref_bf16 = transformer_reference(x, params, heads=heads, dim_head=dim_head,
                                     compute_dtype=jnp.bfloat16)
    err_bf16 = float(jnp.max(jnp.abs(out_bf16 - ref_bf16)))
    assert err_bf16 < 5e-2, f"bf16 path mismatch vs reference: {err_bf16}"

    print("KERNEL_OK")
</pallas_src>

<mosaic_0001>
module attributes {stable_mosaic.version = 11 : i64} {
  func.func @_transformer_kernel(%arg0: i32, %arg1: i32, %arg2: memref<16x32xf32, #tpu.memory_space<vmem>>, %arg3: memref<1x2x32xf32, #tpu.memory_space<vmem>>, %arg4: memref<1x2x32xf32, #tpu.memory_space<vmem>>, %arg5: memref<1x32x96xf32, #tpu.memory_space<vmem>>, %arg6: memref<1x32x32xf32, #tpu.memory_space<vmem>>, %arg7: memref<1x1x32xf32, #tpu.memory_space<vmem>>, %arg8: memref<1x32x64xf32, #tpu.memory_space<vmem>>, %arg9: memref<1x1x64xf32, #tpu.memory_space<vmem>>, %arg10: memref<1x64x32xf32, #tpu.memory_space<vmem>>, %arg11: memref<1x1x32xf32, #tpu.memory_space<vmem>>, %arg12: memref<16x32xf32, #tpu.memory_space<vmem>>, %arg13: memref<16x32xf32, #tpu.memory_space<vmem>>, %arg14: memref<16x32xf32, #tpu.memory_space<vmem>>) attributes {dimension_semantics = [#tpu.dimension_semantics<parallel>, #tpu.dimension_semantics<arbitrary>], iteration_bounds = array<i64: 2, 2>, scalar_prefetch = 0 : i64, scratch_operands = 2 : i64, tpu.core_type = #tpu.core_type<tc>, window_params = [{transform_indices = @transform_0, window_bounds = array<i64: 16, 32>}, {transform_indices = @transform_1, window_bounds = array<i64: 1, 2, 32>}, {transform_indices = @transform_2, window_bounds = array<i64: 1, 2, 32>}, {transform_indices = @transform_3, window_bounds = array<i64: 1, 32, 96>}, {transform_indices = @transform_4, window_bounds = array<i64: 1, 32, 32>}, {transform_indices = @transform_5, window_bounds = array<i64: 1, 1, 32>}, {transform_indices = @transform_6, window_bounds = array<i64: 1, 32, 64>}, {transform_indices = @transform_7, window_bounds = array<i64: 1, 1, 64>}, {transform_indices = @transform_8, window_bounds = array<i64: 1, 64, 32>}, {transform_indices = @transform_9, window_bounds = array<i64: 1, 1, 32>}, {transform_indices = @transform_10, window_bounds = array<i64: 16, 32>}]} {
    %c0_i32 = arith.constant 0 : i32
    %0 = arith.cmpi eq, %arg1, %c0_i32 : i32
    %1 = arith.extui %0 : i1 to i32
    %c0_i32_0 = arith.constant 0 : i32
    %2 = arith.cmpi ne, %1, %c0_i32_0 : i32
    scf.if %2 {
      %c0_73 = arith.constant 0 : index
      %c0_74 = arith.constant 0 : index
      %173 = vector.load %arg2[%c0_73, %c0_74] : memref<16x32xf32, #tpu.memory_space<vmem>>, vector<16x32xf32>
      %c0_75 = arith.constant 0 : index
      %c0_76 = arith.constant 0 : index
      %174 = vector.load %arg13[%c0_75, %c0_76] : memref<16x32xf32, #tpu.memory_space<vmem>>, vector<16x32xf32>
      tpu.vector_store %arg13[%c0_75, %c0_76], %173 {strides = array<i32>} : memref<16x32xf32, #tpu.memory_space<vmem>>, vector<16x32xf32>,
    } else {
    }
    %c0 = arith.constant 0 : index
    %c0_1 = arith.constant 0 : index
    %3 = vector.load %arg13[%c0, %c0_1] : memref<16x32xf32, #tpu.memory_space<vmem>>, vector<16x32xf32>
    %c0_2 = arith.constant 0 : index
    %c0_3 = arith.constant 0 : index
    %c0_4 = arith.constant 0 : index
    %4 = vector.load %arg3[%c0_2, %c0_3, %c0_4] : memref<1x2x32xf32, #tpu.memory_space<vmem>>, vector<1x2x32xf32>
    %5 = vector.shape_cast %4 : vector<1x2x32xf32> to vector<2x32xf32>
    %c0_5 = arith.constant 0 : index
    %c0_6 = arith.constant 0 : index
    %c0_7 = arith.constant 0 : index
    %6 = vector.load %arg4[%c0_5, %c0_6, %c0_7] : memref<1x2x32xf32, #tpu.memory_space<vmem>>, vector<1x2x32xf32>
    %7 = vector.shape_cast %6 : vector<1x2x32xf32> to vector<2x32xf32>
    %8 = vector.extract_strided_slice %5 {offsets = [0, 0], sizes = [1, 32], strides = [1, 1]} : vector<2x32xf32> to vector<1x32xf32>
    %9 = vector.extract_strided_slice %7 {offsets = [0, 0], sizes = [1, 32], strides = [1, 1]} : vector<2x32xf32> to vector<1x32xf32>
    %cst = arith.constant dense<0.000000e+00> : vector<16xf32>
    %10 = vector.multi_reduction <add>, %3, %cst [1] : vector<16x32xf32> to vector<16xf32>
    %11 = vector.shape_cast %10 : vector<16xf32> to vector<16x1xf32>
    %cst_8 = arith.constant 3.200000e+01 : f32
    %12 = vector.broadcast %cst_8 : f32 to vector<16x1xf32>
    %13 = arith.divf %11, %12 : vector<16x1xf32>
    %14 = vector.broadcast %13 : vector<16x1xf32> to vector<16x32xf32>
    %15 = arith.subf %3, %14 : vector<16x32xf32>
    %16 = arith.mulf %15, %15 : vector<16x32xf32>
    %cst_9 = arith.constant dense<0.000000e+00> : vector<16xf32>
    %17 = vector.multi_reduction <add>, %16, %cst_9 [1] : vector<16x32xf32> to vector<16xf32>
    %18 = vector.shape_cast %17 : vector<16xf32> to vector<16x1xf32>
    %cst_10 = arith.constant 3.200000e+01 : f32
    %19 = vector.broadcast %cst_10 : f32 to vector<16x1xf32>
    %20 = arith.divf %18, %19 : vector<16x1xf32>
    %cst_11 = arith.constant 9.99999974E-6 : f32
    %21 = vector.broadcast %cst_11 : f32 to vector<16x1xf32>
    %22 = arith.addf %20, %21 : vector<16x1xf32>
    %23 = math.rsqrt %22 : vector<16x1xf32>
    %24 = vector.broadcast %23 : vector<16x1xf32> to vector<16x32xf32>
    %25 = arith.mulf %15, %24 : vector<16x32xf32>
    %26 = vector.broadcast %8 : vector<1x32xf32> to vector<16x32xf32>
    %27 = arith.mulf %25, %26 : vector<16x32xf32>
    %28 = vector.broadcast %9 : vector<1x32xf32> to vector<16x32xf32>
    %29 = arith.addf %27, %28 : vector<16x32xf32>
    %c0_12 = arith.constant 0 : index
    %c0_13 = arith.constant 0 : index
    %c0_14 = arith.constant 0 : index
    %30 = vector.load %arg5[%c0_12, %c0_13, %c0_14] : memref<1x32x96xf32, #tpu.memory_space<vmem>>, vector<1x32x96xf32>
    %31 = vector.shape_cast %30 : vector<1x32x96xf32> to vector<32x96xf32>
    %cst_15 = arith.constant dense<0.000000e+00> : vector<16x96xf32>
    %32 = tpu.matmul %29, %31, %cst_15 {dimension_numbers = #tpu.dot_dimension_numbers<[1], [0], [0], [1], [0, 0, 1, 1], [], []>} : vector<16x32xf32>, vector<32x96xf32>, vector<16x96xf32> -> vector<16x96xf32>
    %33 = vector.extract_strided_slice %32 {offsets = [0, 0], sizes = [16, 8], strides = [1, 1]} : vector<16x96xf32> to vector<16x8xf32>
    %34 = vector.shape_cast %33 : vector<16x8xf32> to vector<2x8x8xf32>
    %35 = vector.extract_strided_slice %32 {offsets = [0, 32], sizes = [16, 8], strides = [1, 1]} : vector<16x96xf32> to vector<16x8xf32>
    %36 = vector.shape_cast %35 : vector<16x8xf32> to vector<2x8x8xf32>
    %37 = vector.extract_strided_slice %32 {offsets = [0, 64], sizes = [16, 8], strides = [1, 1]} : vector<16x96xf32> to vector<16x8xf32>
    %38 = vector.shape_cast %37 : vector<16x8xf32> to vector<2x8x8xf32>
    "tpu.trace_start"() <{level = 10 : i32, message = "bnd,bmd->bnm"}> : () -> ()
    %cst_16 = arith.constant dense<0.000000e+00> : vector<2x8x8xf32>
    %39 = tpu.matmul %34, %36, %cst_16 {dimension_numbers = #tpu.dot_dimension_numbers<[2], [2], [1], [1], [0, 0, 0, 1, 1, 1], [0], [0]>} : vector<2x8x8xf32>, vector<2x8x8xf32>, vector<2x8x8xf32> -> vector<2x8x8xf32>
    "tpu.trace_stop"() : () -> ()
    %cst_17 = arith.constant 0.353553385 : f32
    %40 = vector.broadcast %cst_17 : f32 to vector<2x8x8xf32>
    %41 = arith.mulf %39, %40 : vector<2x8x8xf32>
    %cst_18 = arith.constant dense<0xFF800000> : vector<2x8xf32>
    %42 = vector.multi_reduction <maximumf>, %41, %cst_18 [2] : vector<2x8x8xf32> to vector<2x8xf32>
    %43 = vector.shape_cast %42 : vector<2x8xf32> to vector<2x8x1xf32>
    %44 = vector.broadcast %43 : vector<2x8x1xf32> to vector<2x8x8xf32>
    %45 = arith.subf %41, %44 : vector<2x8x8xf32>
    %46 = math.exp %45 : vector<2x8x8xf32>
    %cst_19 = arith.constant dense<0.000000e+00> : vector<2x8xf32>
    %47 = vector.multi_reduction <add>, %46, %cst_19 [2] : vector<2x8x8xf32> to vector<2x8xf32>
    %48 = vector.shape_cast %47 : vector<2x8xf32> to vector<2x8x1xf32>
    %49 = vector.broadcast %48 : vector<2x8x1xf32> to vector<2x8x8xf32>
    %50 = arith.divf %46, %49 : vector<2x8x8xf32>
    "tpu.trace_start"() <{level = 10 : i32, message = "bnm,bmd->bnd"}> : () -> ()
    %cst_20 = arith.constant dense<0.000000e+00> : vector<2x8x8xf32>
    %51 = tpu.matmul %50, %38, %cst_20 {dimension_numbers = #tpu.dot_dimension_numbers<[2], [1], [1], [2], [0, 0, 0, 1, 1, 2], [0], [0]>} : vector<2x8x8xf32>, vector<2x8x8xf32>, vector<2x8x8xf32> -> vector<2x8x8xf32>
    "tpu.trace_stop"() : () -> ()
    %52 = vector.shape_cast %51 : vector<2x8x8xf32> to vector<16x8xf32>
    %c0_21 = arith.constant 0 : index
    %c0_22 = arith.constant 0 : index
    %53 = vector.load %arg14[%c0_21, %c0_22] : memref<16x32xf32, #tpu.memory_space<vmem>>, vector<16x8xf32>
    tpu.vector_store %arg14[%c0_21, %c0_22], %52 {strides = array<i32>} : memref<16x32xf32, #tpu.memory_space<vmem>>, vector<16x8xf32>,
    %54 = vector.extract_strided_slice %32 {offsets = [0, 8], sizes = [16, 8], strides = [1, 1]} : vector<16x96xf32> to vector<16x8xf32>
    %55 = vector.shape_cast %54 : vector<16x8xf32> to vector<2x8x8xf32>
    %56 = vector.extract_strided_slice %32 {offsets = [0, 40], sizes = [16, 8], strides = [1, 1]} : vector<16x96xf32> to vector<16x8xf32>
    %57 = vector.shape_cast %56 : vector<16x8xf32> to vector<2x8x8xf32>
    %58 = vector.extract_strided_slice %32 {offsets = [0, 72], sizes = [16, 8], strides = [1, 1]} : vector<16x96xf32> to vector<16x8xf32>
    %59 = vector.shape_cast %58 : vector<16x8xf32> to vector<2x8x8xf32>
    "tpu.trace_start"() <{level = 10 : i32, message = "bnd,bmd->bnm"}> : () -> ()
    %cst_23 = arith.constant dense<0.000000e+00> : vector<2x8x8xf32>
    %60 = tpu.matmul %55, %57, %cst_23 {dimension_numbers = #tpu.dot_dimension_numbers<[2], [2], [1], [1], [0, 0, 0, 1, 1, 1], [0], [0]>} : vector<2x8x8xf32>, vector<2x8x8xf32>, vector<2x8x8xf32> -> vector<2x8x8xf32>
    "tpu.trace_stop"() : () -> ()
    %cst_24 = arith.constant 0.353553385 : f32
    %61 = vector.broadcast %cst_24 : f32 to vector<2x8x8xf32>
    %62 = arith.mulf %60, %61 : vector<2x8x8xf32>
    %cst_25 = arith.constant dense<0xFF800000> : vector<2x8xf32>
    %63 = vector.multi_reduction <maximumf>, %62, %cst_25 [2] : vector<2x8x8xf32> to vector<2x8xf32>
    %64 = vector.shape_cast %63 : vector<2x8xf32> to vector<2x8x1xf32>
    %65 = vector.broadcast %64 : vector<2x8x1xf32> to vector<2x8x8xf32>
    %66 = arith.subf %62, %65 : vector<2x8x8xf32>
    %67 = math.exp %66 : vector<2x8x8xf32>
    %cst_26 = arith.constant dense<0.000000e+00> : vector<2x8xf32>
    %68 = vector.multi_reduction <add>, %67, %cst_26 [2] : vector<2x8x8xf32> to vector<2x8xf32>
    %69 = vector.shape_cast %68 : vector<2x8xf32> to vector<2x8x1xf32>
    %70 = vector.broadcast %69 : vector<2x8x1xf32> to vector<2x8x8xf32>
    %71 = arith.divf %67, %70 : vector<2x8x8xf32>
    "tpu.trace_start"() <{level = 10 : i32, message = "bnm,bmd->bnd"}> : () -> ()
    %cst_27 = arith.constant dense<0.000000e+00> : vector<2x8x8xf32>
    %72 = tpu.matmul %71, %59, %cst_27 {dimension_numbers = #tpu.dot_dimension_numbers<[2], [1], [1], [2], [0, 0, 0, 1, 1, 2], [0], [0]>} : vector<2x8x8xf32>, vector<2x8x8xf32>, vector<2x8x8xf32> -> vector<2x8x8xf32>
    "tpu.trace_stop"() : () -> ()
    %73 = vector.shape_cast %72 : vector<2x8x8xf32> to vector<16x8xf32>
    %c0_28 = arith.constant 0 : index
    %c8 = arith.constant 8 : index
    %74 = vector.load %arg14[%c0_28, %c8] : memref<16x32xf32, #tpu.memory_space<vmem>>, vector<16x8xf32>
    tpu.vector_store %arg14[%c0_28, %c8], %73 {strides = array<i32>} : memref<16x32xf32, #tpu.memory_space<vmem>>, vector<16x8xf32>,
    %75 = vector.extract_strided_slice %32 {offsets = [0, 16], sizes = [16, 8], strides = [1, 1]} : vector<16x96xf32> to vector<16x8xf32>
    %76 = vector.shape_cast %75 : vector<16x8xf32> to vector<2x8x8xf32>
    %77 = vector.extract_strided_slice %32 {offsets = [0, 48], sizes = [16, 8], strides = [1, 1]} : vector<16x96xf32> to vector<16x8xf32>
    %78 = vector.shape_cast %77 : vector<16x8xf32> to vector<2x8x8xf32>
    %79 = vector.extract_strided_slice %32 {offsets = [0, 80], sizes = [16, 8], strides = [1, 1]} : vector<16x96xf32> to vector<16x8xf32>
    %80 = vector.shape_cast %79 : vector<16x8xf32> to vector<2x8x8xf32>
    "tpu.trace_start"() <{level = 10 : i32, message = "bnd,bmd->bnm"}> : () -> ()
    %cst_29 = arith.constant dense<0.000000e+00> : vector<2x8x8xf32>
    %81 = tpu.matmul %76, %78, %cst_29 {dimension_numbers = #tpu.dot_dimension_numbers<[2], [2], [1], [1], [0, 0, 0, 1, 1, 1], [0], [0]>} : vector<2x8x8xf32>, vector<2x8x8xf32>, vector<2x8x8xf32> -> vector<2x8x8xf32>
    "tpu.trace_stop"() : () -> ()
    %cst_30 = arith.constant 0.353553385 : f32
    %82 = vector.broadcast %cst_30 : f32 to vector<2x8x8xf32>
    %83 = arith.mulf %81, %82 : vector<2x8x8xf32>
    %cst_31 = arith.constant dense<0xFF800000> : vector<2x8xf32>
    %84 = vector.multi_reduction <maximumf>, %83, %cst_31 [2] : vector<2x8x8xf32> to vector<2x8xf32>
    %85 = vector.shape_cast %84 : vector<2x8xf32> to vector<2x8x1xf32>
    %86 = vector.broadcast %85 : vector<2x8x1xf32> to vector<2x8x8xf32>
    %87 = arith.subf %83, %86 : vector<2x8x8xf32>
    %88 = math.exp %87 : vector<2x8x8xf32>
    %cst_32 = arith.constant dense<0.000000e+00> : vector<2x8xf32>
    %89 = vector.multi_reduction <add>, %88, %cst_32 [2] : vector<2x8x8xf32> to vector<2x8xf32>
    %90 = vector.shape_cast %89 : vector<2x8xf32> to vector<2x8x1xf32>
    %91 = vector.broadcast %90 : vector<2x8x1xf32> to vector<2x8x8xf32>
    %92 = arith.divf %88, %91 : vector<2x8x8xf32>
    "tpu.trace_start"() <{level = 10 : i32, message = "bnm,bmd->bnd"}> : () -> ()
    %cst_33 = arith.constant dense<0.000000e+00> : vector<2x8x8xf32>
    %93 = tpu.matmul %92, %80, %cst_33 {dimension_numbers = #tpu.dot_dimension_numbers<[2], [1], [1], [2], [0, 0, 0, 1, 1, 2], [0], [0]>} : vector<2x8x8xf32>, vector<2x8x8xf32>, vector<2x8x8xf32> -> vector<2x8x8xf32>
    "tpu.trace_stop"() : () -> ()
    %94 = vector.shape_cast %93 : vector<2x8x8xf32> to vector<16x8xf32>
    %c0_34 = arith.constant 0 : index
    %c16 = arith.constant 16 : index
    %95 = vector.load %arg14[%c0_34, %c16] : memref<16x32xf32, #tpu.memory_space<vmem>>, vector<16x8xf32>
    tpu.vector_store %arg14[%c0_34, %c16], %94 {strides = array<i32>} : memref<16x32xf32, #tpu.memory_space<vmem>>, vector<16x8xf32>,
    %96 = vector.extract_strided_slice %32 {offsets = [0, 24], sizes = [16, 8], strides = [1, 1]} : vector<16x96xf32> to vector<16x8xf32>
    %97 = vector.shape_cast %96 : vector<16x8xf32> to vector<2x8x8xf32>
    %98 = vector.extract_strided_slice %32 {offsets = [0, 56], sizes = [16, 8], strides = [1, 1]} : vector<16x96xf32> to vector<16x8xf32>
    %99 = vector.shape_cast %98 : vector<16x8xf32> to vector<2x8x8xf32>
    %100 = vector.extract_strided_slice %32 {offsets = [0, 88], sizes = [16, 8], strides = [1, 1]} : vector<16x96xf32> to vector<16x8xf32>
    %101 = vector.shape_cast %100 : vector<16x8xf32> to vector<2x8x8xf32>
    "tpu.trace_start"() <{level = 10 : i32, message = "bnd,bmd->bnm"}> : () -> ()
    %cst_35 = arith.constant dense<0.000000e+00> : vector<2x8x8xf32>
    %102 = tpu.matmul %97, %99, %cst_35 {dimension_numbers = #tpu.dot_dimension_numbers<[2], [2], [1], [1], [0, 0, 0, 1, 1, 1], [0], [0]>} : vector<2x8x8xf32>, vector<2x8x8xf32>, vector<2x8x8xf32> -> vector<2x8x8xf32>
    "tpu.trace_stop"() : () -> ()
    %cst_36 = arith.constant 0.353553385 : f32
    %103 = vector.broadcast %cst_36 : f32 to vector<2x8x8xf32>
    %104 = arith.mulf %102, %103 : vector<2x8x8xf32>
    %cst_37 = arith.constant dense<0xFF800000> : vector<2x8xf32>
    %105 = vector.multi_reduction <maximumf>, %104, %cst_37 [2] : vector<2x8x8xf32> to vector<2x8xf32>
    %106 = vector.shape_cast %105 : vector<2x8xf32> to vector<2x8x1xf32>
    %107 = vector.broadcast %106 : vector<2x8x1xf32> to vector<2x8x8xf32>
    %108 = arith.subf %104, %107 : vector<2x8x8xf32>
    %109 = math.exp %108 : vector<2x8x8xf32>
    %cst_38 = arith.constant dense<0.000000e+00> : vector<2x8xf32>
    %110 = vector.multi_reduction <add>, %109, %cst_38 [2] : vector<2x8x8xf32> to vector<2x8xf32>
    %111 = vector.shape_cast %110 : vector<2x8xf32> to vector<2x8x1xf32>
    %112 = vector.broadcast %111 : vector<2x8x1xf32> to vector<2x8x8xf32>
    %113 = arith.divf %109, %112 : vector<2x8x8xf32>
    "tpu.trace_start"() <{level = 10 : i32, message = "bnm,bmd->bnd"}> : () -> ()
    %cst_39 = arith.constant dense<0.000000e+00> : vector<2x8x8xf32>
    %114 = tpu.matmul %113, %101, %cst_39 {dimension_numbers = #tpu.dot_dimension_numbers<[2], [1], [1], [2], [0, 0, 0, 1, 1, 2], [0], [0]>} : vector<2x8x8xf32>, vector<2x8x8xf32>, vector<2x8x8xf32> -> vector<2x8x8xf32>
    "tpu.trace_stop"() : () -> ()
    %115 = vector.shape_cast %114 : vector<2x8x8xf32> to vector<16x8xf32>
    %c0_40 = arith.constant 0 : index
    %c24 = arith.constant 24 : index
    %116 = vector.load %arg14[%c0_40, %c24] : memref<16x32xf32, #tpu.memory_space<vmem>>, vector<16x8xf32>
    tpu.vector_store %arg14[%c0_40, %c24], %115 {strides = array<i32>} : memref<16x32xf32, #tpu.memory_space<vmem>>, vector<16x8xf32>,
    %c0_41 = arith.constant 0 : index
    %c0_42 = arith.constant 0 : index
    %117 = vector.load %arg14[%c0_41, %c0_42] : memref<16x32xf32, #tpu.memory_space<vmem>>, vector<16x32xf32>
    %c0_43 = arith.constant 0 : index
    %c0_44 = arith.constant 0 : index
    %c0_45 = arith.constant 0 : index
    %118 = vector.load %arg6[%c0_43, %c0_44, %c0_45] : memref<1x32x32xf32, #tpu.memory_space<vmem>>, vector<1x32x32xf32>
    %119 = vector.shape_cast %118 : vector<1x32x32xf32> to vector<32x32xf32>
    %cst_46 = arith.constant dense<0.000000e+00> : vector<16x32xf32>
    %120 = tpu.matmul %117, %119, %cst_46 {dimension_numbers = #tpu.dot_dimension_numbers<[1], [0], [0], [1], [0, 0, 1, 1], [], []>} : vector<16x32xf32>, vector<32x32xf32>, vector<16x32xf32> -> vector<16x32xf32>
    %c0_47 = arith.constant 0 : index
    %c0_48 = arith.constant 0 : index
    %c0_49 = arith.constant 0 : index
    %121 = vector.load %arg7[%c0_47, %c0_48, %c0_49] : memref<1x1x32xf32, #tpu.memory_space<vmem>>, vector<1x1x32xf32>
    %122 = vector.shape_cast %121 : vector<1x1x32xf32> to vector<1x32xf32>
    %123 = vector.broadcast %122 : vector<1x32xf32> to vector<16x32xf32>
    %124 = arith.addf %120, %123 : vector<16x32xf32>
    %125 = arith.addf %3, %124 : vector<16x32xf32>
    %126 = vector.extract_strided_slice %5 {offsets = [1, 0], sizes = [1, 32], strides = [1, 1]} : vector<2x32xf32> to vector<1x32xf32>
    %127 = vector.extract_strided_slice %7 {offsets = [1, 0], sizes = [1, 32], strides = [1, 1]} : vector<2x32xf32> to vector<1x32xf32>
    %cst_50 = arith.constant dense<0.000000e+00> : vector<16xf32>
    %128 = vector.multi_reduction <add>, %125, %cst_50 [1] : vector<16x32xf32> to vector<16xf32>
    %129 = vector.shape_cast %128 : vector<16xf32> to vector<16x1xf32>
    %cst_51 = arith.constant 3.200000e+01 : f32
    %130 = vector.broadcast %cst_51 : f32 to vector<16x1xf32>
    %131 = arith.divf %129, %130 : vector<16x1xf32>
    %132 = vector.broadcast %131 : vector<16x1xf32> to vector<16x32xf32>
    %133 = arith.subf %125, %132 : vector<16x32xf32>
    %134 = arith.mulf %133, %133 : vector<16x32xf32>
    %cst_52 = arith.constant dense<0.000000e+00> : vector<16xf32>
    %135 = vector.multi_reduction <add>, %134, %cst_52 [1] : vector<16x32xf32> to vector<16xf32>
    %136 = vector.shape_cast %135 : vector<16xf32> to vector<16x1xf32>
    %cst_53 = arith.constant 3.200000e+01 : f32
    %137 = vector.broadcast %cst_53 : f32 to vector<16x1xf32>
    %138 = arith.divf %136, %137 : vector<16x1xf32>
    %cst_54 = arith.constant 9.99999974E-6 : f32
    %139 = vector.broadcast %cst_54 : f32 to vector<16x1xf32>
    %140 = arith.addf %138, %139 : vector<16x1xf32>
    %141 = math.rsqrt %140 : vector<16x1xf32>
    %142 = vector.broadcast %141 : vector<16x1xf32> to vector<16x32xf32>
    %143 = arith.mulf %133, %142 : vector<16x32xf32>
    %144 = vector.broadcast %126 : vector<1x32xf32> to vector<16x32xf32>
    %145 = arith.mulf %143, %144 : vector<16x32xf32>
    %146 = vector.broadcast %127 : vector<1x32xf32> to vector<16x32xf32>
    %147 = arith.addf %145, %146 : vector<16x32xf32>
    %c0_55 = arith.constant 0 : index
    %c0_56 = arith.constant 0 : index
    %c0_57 = arith.constant 0 : index
    %148 = vector.load %arg8[%c0_55, %c0_56, %c0_57] : memref<1x32x64xf32, #tpu.memory_space<vmem>>, vector<1x32x64xf32>
    %149 = vector.shape_cast %148 : vector<1x32x64xf32> to vector<32x64xf32>
    %cst_58 = arith.constant dense<0.000000e+00> : vector<16x64xf32>
    %150 = tpu.matmul %147, %149, %cst_58 {dimension_numbers = #tpu.dot_dimension_numbers<[1], [0], [0], [1], [0, 0, 1, 1], [], []>} : vector<16x32xf32>, vector<32x64xf32>, vector<16x64xf32> -> vector<16x64xf32>
    %c0_59 = arith.constant 0 : index
    %c0_60 = arith.constant 0 : index
    %c0_61 = arith.constant 0 : index
    %151 = vector.load %arg9[%c0_59, %c0_60, %c0_61] : memref<1x1x64xf32, #tpu.memory_space<vmem>>, vector<1x1x64xf32>
    %152 = vector.shape_cast %151 : vector<1x1x64xf32> to vector<1x64xf32>
    %153 = vector.broadcast %152 : vector<1x64xf32> to vector<16x64xf32>
    %154 = arith.addf %150, %153 : vector<16x64xf32>
    %155 = arith.negf %154 : vector<16x64xf32>
    %156 = math.exp %155 : vector<16x64xf32>
    %cst_62 = arith.constant 1.000000e+00 : f32
    %157 = vector.broadcast %cst_62 : f32 to vector<16x64xf32>
    %158 = arith.addf %157, %156 : vector<16x64xf32>
    %159 = arith.divf %157, %158 : vector<16x64xf32>
    %160 = arith.mulf %154, %159 : vector<16x64xf32>
    %c0_63 = arith.constant 0 : index
    %c0_64 = arith.constant 0 : index
    %c0_65 = arith.constant 0 : index
    %161 = vector.load %arg10[%c0_63, %c0_64, %c0_65] : memref<1x64x32xf32, #tpu.memory_space<vmem>>, vector<1x64x32xf32>
    %162 = vector.shape_cast %161 : vector<1x64x32xf32> to vector<64x32xf32>
    %cst_66 = arith.constant dense<0.000000e+00> : vector<16x32xf32>
    %163 = tpu.matmul %160, %162, %cst_66 {dimension_numbers = #tpu.dot_dimension_numbers<[1], [0], [0], [1], [0, 0, 1, 1], [], []>} : vector<16x64xf32>, vector<64x32xf32>, vector<16x32xf32> -> vector<16x32xf32>
    %c0_67 = arith.constant 0 : index
    %c0_68 = arith.constant 0 : index
    %c0_69 = arith.constant 0 : index
    %164 = vector.load %arg11[%c0_67, %c0_68, %c0_69] : memref<1x1x32xf32, #tpu.memory_space<vmem>>, vector<1x1x32xf32>
    %165 = vector.shape_cast %164 : vector<1x1x32xf32> to vector<1x32xf32>
    %166 = vector.broadcast %165 : vector<1x32xf32> to vector<16x32xf32>
    %167 = arith.addf %163, %166 : vector<16x32xf32>
    %168 = arith.addf %125, %167 : vector<16x32xf32>
    %c0_70 = arith.constant 0 : index
    %c0_71 = arith.constant 0 : index
    %169 = vector.load %arg13[%c0_70, %c0_71] : memref<16x32xf32, #tpu.memory_space<vmem>>, vector<16x32xf32>
    tpu.vector_store %arg13[%c0_70, %c0_71], %168 {strides = array<i32>} : memref<16x32xf32, #tpu.memory_space<vmem>>, vector<16x32xf32>,
    %c1_i32 = arith.constant 1 : i32
    %170 = arith.cmpi eq, %arg1, %c1_i32 : i32
    %171 = arith.extui %170 : i1 to i32
    %c0_i32_72 = arith.constant 0 : i32
    %172 = arith.cmpi ne, %171, %c0_i32_72 : i32
    scf.if %172 {
      %c0_73 = arith.constant 0 : index
      %c0_74 = arith.constant 0 : index
      %173 = vector.load %arg12[%c0_73, %c0_74] : memref<16x32xf32, #tpu.memory_space<vmem>>, vector<16x32xf32>
      tpu.vector_store %arg12[%c0_73, %c0_74], %168 {strides = array<i32>} : memref<16x32xf32, #tpu.memory_space<vmem>>, vector<16x32xf32>,
    } else {
    }
    return
  }
  func.func @transform_0(%arg0: i32, %arg1: i32) -> (i32, i32) {
    %c0_i32 = arith.constant 0 : i32
    %c0_i32_0 = arith.constant 0 : i32
    return %arg0, %c0_i32 : i32, i32
  }
  func.func @transform_1(%arg0: i32, %arg1: i32) -> (i32, i32, i32) {
    %c0_i32 = arith.constant 0 : i32
    %c0_i32_0 = arith.constant 0 : i32
    %c0_i32_1 = arith.constant 0 : i32
    return %arg1, %c0_i32, %c0_i32_0 : i32, i32, i32
  }
  func.func @transform_2(%arg0: i32, %arg1: i32) -> (i32, i32, i32) {
    %c0_i32 = arith.constant 0 : i32
    %c0_i32_0 = arith.constant 0 : i32
    %c0_i32_1 = arith.constant 0 : i32
    return %arg1, %c0_i32, %c0_i32_0 : i32, i32, i32
  }
  func.func @transform_3(%arg0: i32, %arg1: i32) -> (i32, i32, i32) {
    %c0_i32 = arith.constant 0 : i32
    %c0_i32_0 = arith.constant 0 : i32
    %c0_i32_1 = arith.constant 0 : i32
    return %arg1, %c0_i32, %c0_i32_0 : i32, i32, i32
  }
  func.func @transform_4(%arg0: i32, %arg1: i32) -> (i32, i32, i32) {
    %c0_i32 = arith.constant 0 : i32
    %c0_i32_0 = arith.constant 0 : i32
    %c0_i32_1 = arith.constant 0 : i32
    return %arg1, %c0_i32, %c0_i32_0 : i32, i32, i32
  }
  func.func @transform_5(%arg0: i32, %arg1: i32) -> (i32, i32, i32) {
    %c0_i32 = arith.constant 0 : i32
    %c0_i32_0 = arith.constant 0 : i32
    %c0_i32_1 = arith.constant 0 : i32
    return %arg1, %c0_i32, %c0_i32_0 : i32, i32, i32
  }
  func.func @transform_6(%arg0: i32, %arg1: i32) -> (i32, i32, i32) {
    %c0_i32 = arith.constant 0 : i32
    %c0_i32_0 = arith.constant 0 : i32
    %c0_i32_1 = arith.constant 0 : i32
    return %arg1, %c0_i32, %c0_i32_0 : i32, i32, i32
  }
  func.func @transform_7(%arg0: i32, %arg1: i32) -> (i32, i32, i32) {
    %c0_i32 = arith.constant 0 : i32
    %c0_i32_0 = arith.constant 0 : i32
    %c0_i32_1 = arith.constant 0 : i32
    return %arg1, %c0_i32, %c0_i32_0 : i32, i32, i32
  }
  func.func @transform_8(%arg0: i32, %arg1: i32) -> (i32, i32, i32) {
    %c0_i32 = arith.constant 0 : i32
    %c0_i32_0 = arith.constant 0 : i32
    %c0_i32_1 = arith.constant 0 : i32
    return %arg1, %c0_i32, %c0_i32_0 : i32, i32, i32
  }
  func.func @transform_9(%arg0: i32, %arg1: i32) -> (i32, i32, i32) {
    %c0_i32 = arith.constant 0 : i32
    %c0_i32_0 = arith.constant 0 : i32
    %c0_i32_1 = arith.constant 0 : i32
    return %arg1, %c0_i32, %c0_i32_0 : i32, i32, i32
  }
  func.func @transform_10(%arg0: i32, %arg1: i32) -> (i32, i32) {
    %c0_i32 = arith.constant 0 : i32
    %c0_i32_0 = arith.constant 0 : i32
    return %arg0, %c0_i32 : i32, i32
  }
}

</mosaic_0001>

<bundles_post_ra>
// kernel: tpu_custom_call.1
= control target key start
LH: loop header
LB: loop body
LE: loop exit
PB: predicated region body
PF: predicated region fallthrough
CT: control target
= control target key end

     0   :  { %s3943_s0 = inlined_call_operand.hbm [shape: f32[32,32], index: 0, kind: input, shape index: {}]   ;;  %s3944_s1 = inlined_call_operand.hbm [shape: f32[2,2,32], index: 1, kind: input, shape index: {}]   ;;  %s3945_s2 = inlined_call_operand.vmem [shape: f32[2,2,32], index: 2, kind: input, shape index: {}]   ;;  %s3946_s3 = inlined_call_operand.vmem [shape: f32[2,32,96], index: 3, kind: input, shape index: {}]   ;;  %s3947_s4 = inlined_call_operand.vmem [shape: f32[2,32,32], index: 4, kind: input, shape index: {}]   ;;  %s3948_s5 = inlined_call_operand.vmem [shape: f32[2,1,32], index: 5, kind: input, shape index: {}]   ;;  %s3949_s6 = inlined_call_operand.vmem [shape: f32[2,32,64], index: 6, kind: input, shape index: {}]   ;;  %s3950_s7 = inlined_call_operand.vmem [shape: f32[2,1,64], index: 7, kind: input, shape index: {}]   ;;  %s3951_s8 = inlined_call_operand.vmem [shape: f32[2,64,32], index: 8, kind: input, shape index: {}]   ;;  %s3952_s9 = inlined_call_operand.vmem [shape: f32[2,1,32], index: 9, kind: input, shape index: {}]   ;;  %s3953_s10 = inlined_call_operand.hbm [shape: f32[32,32], index: 10, kind: output, shape index: {}]  }
   0x1   :  { %3976 = sst [smem:[#allocation28_spill]] %s3943_s0 }
   0x2   :  { %3977 = sst [smem:[#allocation29_spill]] %s3944_s1 }
   0x3   :  { %3978 = sst [smem:[#allocation30_spill]] %s3945_s2 }
   0x4   :  { %3979 = sst [smem:[#allocation31_spill]] %s3946_s3 }
   0x5   :  { %3980 = sst [smem:[#allocation32_spill]] %s3947_s4 }
   0x6   :  { %3981 = sst [smem:[#allocation33_spill]] %s3951_s8 }
   0x7   :  { %3982 = sst [smem:[#allocation34_spill]] %s3953_s10 }
   0x8   :  { %15 = vsyncpa [#allocation5], 0 }
   0x9   :  { %17 = vsyncpa [#allocation5 + $0x1], 0 }
   0xa   :  { %18 = vsyncpa [#allocation8], 0 }
   0xb   :  { %20 = vsyncpa [#allocation8 + $0x1], 0 }
   0xc   :  { %21 = vsyncpa [#allocation6], 0 }
   0xd   :  { %23 = vsyncpa [#allocation6 + $0x1], 0  ;;  %s3366_s13 = smov 0   ;;  %s3368_s14 = smov 0  }
   0xe   :  { %s3370_s15 = smov 0   ;;  %s3372_s16 = smov 0  }
   0xf   :  { %s3374_s17 = smov 0   ;;  %s3376_s18 = smov 0  }
  0x10   :  { %s3378_s19 = smov 0   ;;  %s3380_s20 = smov 0  }
  0x11   :  { %s3382_s21 = smov 0   ;;  %s3384_s22 = smov 0  }
  0x12   :  { %s3386_s23 = smov 0  }
  0x13 LB: > { %3983 = sst [smem:[#allocation13_spill]] %s3251_s14  ;;  %s2624_s24 = sadd.s32 4294967294, %s3287_s23   ;;  %s3287_s23 = sphi %s3386_s23, %s29_s23   ;;  %s3283_s22 = sphi %s3384_s22, %s4038_s22   ;;  %s3279_s21 = sphi %s3382_s21, %s4037_s21   ;;  %s3275_s20 = sphi %s3380_s20, %s4036_s20   ;;  %s3271_s19 = sphi %s3378_s19, %s4035_s19   ;;  %s3267_s18 = sphi %s3376_s18, %s4034_s18   ;;  %s3263_s17 = sphi %s3374_s17, %s4033_s17   ;;  %s3259_s16 = sphi %s3372_s16, %s4032_s16   ;;  %s3255_s15 = sphi %s3370_s15, %s4031_s15   ;;  %s3251_s14 = sphi %s3368_s14, %s4030_s14   ;;  %s3247_s13 = sphi %s3366_s13, %s4029_s13  }
  0x14   : > { %3984 = sst [smem:[#allocation14_spill]] %s3255_s15  ;;  %p3957_p0 = scmp.ne.s32.totalorder %s3267_s18, %s3263_s17 }
  0x15   : > { %3985 = sst [smem:[#allocation15_spill]] %s3259_s16  ;;  %p3958_p1 = scmp.eq.s32.totalorder %s3287_s23, 0 }
  0x16   : > { %3986 = sst [smem:[#allocation16_spill]] %s3263_s17  ;;  %p3959_p2 = scmp.ne.s32.totalorder %s3263_s17, %s3259_s16 }
  0x17   : > { %3987 = sst [smem:[#allocation17_spill]] %s3267_s18  ;;  %p325_p3 = scmp.eq.s32.totalorder %s2624_s24, 3 }
  0x18   : > { %3988 = sst [smem:[#allocation18_spill]] %s3275_s20  ;;  %p57_p4 = por %p3958_p1, %p3957_p0 }
  0x19   : > { %3989 = sst [smem:[#allocation19_spill]] %s3279_s21  ;;  %p3436_p5 = por %p325_p3, %p3959_p2 }
  0x1a   : > { %3990 = sst [smem:[#allocation20_spill]] %s3283_s22  ;;  %p3956_p6 = scmp.lt.s32.totalorder %s3287_s23, 4 }
  0x1b   : > { %3991 = sst [smem:[#allocation21_spill]] %s3287_s23  ;;  %s345_s27 = sand.u32 1, %s3267_s18  }
  0x1c   : > { %s3992_s26 = scalar_select %p3436_p5, 1, 0 }
  0x1d   : > { %s2689_s28 = sshll.u32 %s3283_s22, 8  ;;  %s2627_s29 = sshll.u32 %s345_s27, 4 }
  0x1e   : > { %3993 = sst [smem:[#allocation22_spill]] %s3992_s26  ;;  %s3994_s0 = sld [smem:[#allocation28_spill]] }
  0x1f   : > { %s349_s24 = scalar_lea.vmem [#allocation4], %s2627_s29  ;;  %p3450_p7 = pnand %p3956_p6, %p57_p4 }
  0x20   : > { %s356_s25 = sshll.u32 %s349_s24, 4  ;;  %s3456_s26 = scalar_lea.sflag [#allocation5], %s345_s27  ;;  %s3454_s25 = int_to_ptr.vmem [resolvable:$true] %s356_s25 }
  0x21   : > { %p3103_p9 = pneg %p3450_p7 }
  0x24   : > { %s3446_s12 = scalar_lea.hbm %s3994_s0, %s2689_s28  ;;  %s3106_s11 = scalar_lea.hbm %s3994_s0, 512 }
  0x25   : > { %s3101_s30 = scalar_lea.hbm %s3446_s12, 256  ;;  %p3107_p12 = scmp.lt.u32.totalorder %s3446_s12, %s3994_s0 }
  0x26   : > { %p3102_p8 = scmp.ne.s32.totalorder %s3446_s12, %s3101_s30  ;;  %p3108_p13 = scmp.lt.u32.totalorder %s3106_s11, %s3101_s30 }
  0x27   : > { %p3110_p4 = scmp.lt.u32.totalorder %s3101_s30, %s3446_s12 }
  0x28   : > { %p3104_p10 = pnand %p3103_p9, %p3102_p8  ;;  %p3109_p3 = por %p3108_p13, %p3107_p12 }
  0x2a   : > { %p3105_p11 = pneg %p3104_p10  ;;  %p3111_p6 = por %p3110_p4, %p3109_p3 }
  0x2c   : > { %p3112_p0 = pnand %p3111_p6, %p3105_p11 }
  0x2e   : > { %3115 = shalt.err (!%p3112_p0)
}
  0x2f   : > { %s3116_s27 = scalar_lea.vmem %s3454_s25, 256  ;;  %s3289_s28 = smov [#allocation4]  }
  0x30   : > { %p3117_p8 = scmp.ne.s32.totalorder %s3454_s25, %s3116_s27  ;;  %s3121_s29 = sshll.u32 %s3289_s28, 4  ;;  %s3122_s29 = int_to_ptr.vmem [resolvable:$false] %s3121_s29 }
  0x31   : > { %s3123_s20 = scalar_lea.vmem %s3122_s29, 512  ;;  %p3124_p2 = scmp.lt.s32.totalorder %s3454_s25, %s3122_s29 }
  0x32   : > { %p3119_p10 = pnand %p3117_p8, %p3103_p9  ;;  %p3125_p12 = scmp.lt.s32.totalorder %s3123_s20, %s3116_s27 }
  0x34   : > { %p3120_p1 = pneg %p3119_p10  ;;  %p3126_p13 = por %p3125_p12, %p3124_p2 }
  0x36   : > { %p3127_p3 = pnand %p3126_p13, %p3120_p1 }
  0x38   : > { %3130 = shalt.err (!%p3127_p3)
}
  0x39   : > { %s3290_s30 = smov 128   ;;  %s3291_s11 = smov 8  }
  0x3a   : > { %2936 = dma.hbm_to_vmem [thread:$0]  (!%p3450_p7), %s3446_s12, 256, %s3454_s25, %s3456_s26, %s3290_s30, %s3290_s30, %s3291_s11  }
  0x3b   : > { %p2632_p0 = scmp.ge.s32.totalorder %s3287_s23, 1  ;;  %p439_p1 = scmp.lt.s32.totalorder %s3287_s23, 5 }
  0x3c   : > { %s2623_s27 = sadd.s32 4294967295, %s3287_s23   ;;  %s38_s28 = sadd.s32 1, %s3279_s21 }
  0x3d   : > { %p3486_p2 = pnand %p2632_p0, %p439_p1  ;;  %s41_s29 = sadd.s32 1, %s3283_s22 }
  0x3e   : > { %p39_p6 = scmp.ge.s32.totalorder %s38_s28, 2  ;;  %p3493_p9 = scmp.eq.s32.totalorder %s2623_s27, 0 }
  0x3f   : > { %s74_s10 = sadd.s32 1, %s3255_s15  ;;  %p81_p7 = scmp.ne.s32.totalorder %s3255_s15, %s3251_s14 }
  0x40   : > { %s4040_s28 = smov (%p39_p6, %s38_s28), 0  ;;  %s4042_s29 = smov (!%p39_p6, %s41_s29), %s3283_s22 }
  0x41   : > { %3998 = sst [smem:[#allocation23_spill]] %s4040_s28  ;;  %p3999_p11 = scmp.ne.s32.totalorder %s3263_s17, %s3259_s16 }
  0x42   : > { %s71_s26 = ssub.s32 %s3279_s21, %s4040_s28  ;;  %p43_p8 = scmp.ge.s32.totalorder %s4042_s29, 2 }
  0x43   : > { %p3508_p4 = por %p3493_p9, %p3999_p11  ;;  %p72_p10 = scmp.eq.s32.totalorder %s71_s26, 0 }
  0x44   : > { %p4001_p12 = scmp.eq.s32.totalorder %s3287_s23, 0  ;;  %p87_p3 = scmp.ne.s32.totalorder %s3251_s14, %s3247_s13 }
  0x45   : > { %s4000_s25 = scalar_select %p3508_p4, 1, 0 }
  0x46   : > { %p3516_p13 = por %p81_p7, %p4001_p12  ;;  %s4044_s29 = smov (%p43_p8, %s4042_s29), 0 }
  0x47   : > { %4003 = sst [smem:[#allocation24_spill]] %s4044_s29  ;;  %s45_s11 = ssub.s32 %s3283_s22, %s4044_s29 }
  0x48   : > { %s3525_s30 = scalar_select %p72_p10, %s3255_s15, %s74_s10  }
  0x49   : > { %p3531_p0 = por %p87_p3, %p3493_p9  ;;  %p46_p1 = scmp.eq.s32.totalorder %s45_s11, 0 }
  0x4a   : > { %4004 = sst [smem:[#allocation25_spill]] %s3525_s30  ;;  %p319_p6 = scmp.eq.s32.totalorder %s2623_s27, 3 }
  0x4b   : > { %s4005_s0 = scalar_select %p3531_p0, 1, 0 }
  0x4c   : > { %s366_s26 = sand.u32 1, %s3255_s15   ;;  %s2631_s28 = sshll.u32 %s3279_s21, 5 }
  0x4d   : > { %s4006_s16 = sadd.s32 1, %s3267_s18  ;;  %p4008_p7 = scmp.ne.s32.totalorder %s3267_s18, %s3263_s17 }
  0x4e   : > { %s3540_s8 = scalar_select %p46_p1, %s3267_s18, %s4006_s16  }
  0x4f   : > { %p3545_p11 = por %p319_p6, %p4008_p7  ;;  %s2630_s10 = sshll.u32 %s366_s26, 1 }
  0x50   : > { %4007 = sst [smem:[#allocation26_spill]] %s3540_s8  ;;  %s4011_s1 = sld [smem:[#allocation29_spill]] }
  0x51   : > { %s4009_s13 = scalar_select %p3545_p11, 1, 0 }
  0x52   : > { %p4012_p9 = scmp.lt.s32.totalorder %s3287_s23, 4  ;;  %s370_s27 = scalar_lea.vmem [#allocation7], %s2630_s10 }
  0x53   : > { %4010 = sst [smem:[#allocation27_spill]] %s4009_s13  ;;  %s377_s11 = sshll.u32 %s370_s27, 4  ;;  %s3562_s11 = int_to_ptr.vmem [resolvable:$true] %s377_s11 }
  0x54   : > { %p3558_p8 = pnand %p4012_p9, %p3516_p13  ;;  %s367_s22 = scalar_lea.sflag [#allocation8], %s366_s26 }
  0x56   : > { %s3552_s20 = scalar_lea.hbm %s4011_s1, %s2631_s28  ;;  %p3133_p12 = pneg %p3558_p8 }
  0x57   : > { %s3131_s29 = scalar_lea.hbm %s3552_s20, 32  ;;  %s3136_s30 = scalar_lea.hbm %s4011_s1, 64 }
  0x58   : > { %p3132_p10 = scmp.ne.s32.totalorder %s3552_s20, %s3131_s29  ;;  %p3137_p13 = scmp.lt.u32.totalorder %s3552_s20, %s4011_s1 }
  0x59   : > { %p3138_p6 = scmp.lt.u32.totalorder %s3136_s30, %s3131_s29  ;;  %p3140_p9 = scmp.lt.u32.totalorder %s3131_s29, %s3552_s20 }
  0x5a   : > { %p3134_p3 = pnand %p3133_p12, %p3132_p10 }
  0x5b   : > { %p3139_p7 = por %p3138_p6, %p3137_p13 }
  0x5c   : > { %p3135_p1 = pneg %p3134_p3 }
  0x5d   : > { %p3141_p5 = por %p3140_p9, %p3139_p7 }
  0x5f   : > { %p3142_p11 = pnand %p3141_p5, %p3135_p1 }
  0x61   : > { %3145 = shalt.err (!%p3142_p11)
}
  0x62   : > { %s3146_s26 = scalar_lea.vmem %s3562_s11, 32  ;;  %s3292_s10 = smov [#allocation7]  }
  0x63   : > { %p3147_p10 = scmp.ne.s32.totalorder %s3562_s11, %s3146_s26  ;;  %s3151_s27 = sshll.u32 %s3292_s10, 4  ;;  %s3152_s27 = int_to_ptr.vmem [resolvable:$false] %s3151_s27 }
  0x64   : > { %s3153_s8 = scalar_lea.vmem %s3152_s27, 64  ;;  %p3154_p4 = scmp.lt.s32.totalorder %s3562_s11, %s3152_s27 }
  0x65   : > { %p3149_p3 = pnand %p3147_p10, %p3133_p12  ;;  %p3155_p13 = scmp.lt.s32.totalorder %s3153_s8, %s3146_s26 }
  0x67   : > { %p3150_p0 = pneg %p3149_p3  ;;  %p3156_p6 = por %p3155_p13, %p3154_p4 }
  0x69   : > { %p3157_p7 = pnand %p3156_p6, %p3150_p0 }
  0x6b   : > { %3160 = shalt.err (!%p3157_p7)
}
  0x6c   : > { %2939 = dma.hbm_to_vmem [thread:$0]  (!%p3558_p8), %s3552_s20, 32, %s3562_s11, %s367_s22  }
  0x6d   : > { %443 = sbr.rel (%p3486_p2) target bundleno = 4274 (0x10b2), region = 60  ;;  %s3592_s21 = sand.u32 (!%p3486_p2), 1, %s3263_s17  }
  0x6e   : > { %s2633_s29 = sshll.u32 (!%p3486_p2), %s3592_s21, 4  ;;  %s446_s28 = scalar_lea.sflag (!%p3486_p2), [#allocation5], %s3592_s21 }
  0x6f   : > { %s449_s12 = scalar_lea.vmem (!%p3486_p2), [#allocation4], %s2633_s29  ;;  %p4014_p5 = scmp.ne.s32.totalorder (!%p3486_p2), %s4000_s25, 0 }
  0x74   : > { %3234 = dma.done.wait (%p4014_p5), %s446_s28, 256  }
  0x75   : > { %3236 = vsyncadd (%p4014_p5), %s446_s28, 4294967040  ;;  %s454_s22 = sand.u32 1, %s3251_s14   ;;  %p4015_p2 = scmp.ne.s32.totalorder %s4005_s0, 0 }
  0x76   : > { %s3601_s20 = sshll.u32 %s454_s22, 1  ;;  %s455_s24 = scalar_lea.sflag [#allocation8], %s454_s22 }
  0x77   : > { %3238 = dma.done.wait (%p4015_p2), %s455_s24, 32  }
  0x78   : > { %3240 = vsyncadd (%p4015_p2), %s455_s24, 4294967264  ;;  %p534_p4 = scmp.lt.s32.totalorder %s3271_s19, 1  ;;  %s4016_s2 = sld [smem:[#allocation30_spill]] }
  0x79   : > { %s4017_s3 = sld [smem:[#allocation31_spill]]  ;;  %s4018_s4 = sld [smem:[#allocation32_spill]] }
  0x7a   : > { %s3610_s11 = scalar_select %p534_p4, %s3271_s19, 1 }
  0x7b   : > { %s4019_s23 = sld [smem:[#allocation33_spill]]  ;;  %s3652_s1 = scalar_lea.vmem [#allocation9], %s2633_s29 }
  0x7c   : > { %s2636_s25 = sshll.u32 %s3610_s11, 1  ;;  %s2690_s30 = sshll.u32 %s3610_s11, 5 }
  0x7d   : > { %s550_s17 = scalar_lea.vmem %s3948_s5, %s3610_s11  ;;  %s3636_s26 = scalar_lea.vmem %s3949_s6, %s2690_s30 }
  0x7e   : > { %s3617_s27 = scalar_lea.vmem %s4016_s2, %s2636_s25  ;;  %s558_s0 = scalar_lea.vmem %s3950_s7, %s3610_s11 }
  0x7f   : > { %s3622_s28 = scalar_lea.vmem %s4017_s3, %s2690_s30  ;;  %s3627_s16 = scalar_lea.vmem %s4018_s4, %s2690_s30 }
  0x80   : > { %s2693_s8 = sshll.u32 %s3610_s11, 6  ;;  %s566_s22 = scalar_lea.vmem %s3952_s9, %s3610_s11 }
  0x81   : > { %s3650_s13 = scalar_lea.vmem %s4019_s23, %s2693_s8  ;;  %p2645_p0 = scmp.ne.s32.totalorder %s3271_s19, 0 }
  0x82   : > { %v572_v0 = vld [vmem:[%s449_s12] sm:$0xff] (!%p2645_p0)  ;;  %vm574_vm0 = vcmask (!%p2645_p0), 261120   ;;  %v573_v1 = vld [vmem:[%s449_s12 + $0x8] sm:$0xff] (!%p2645_p0) }
  0x83   : > { %571 = sbr.rel (%p2645_p0) target bundleno = 138 (0x8a), region = 72  ;;  %575 = vst.msk [vmem:[#allocation2] sm:$0xff] (!%p2645_p0), %vm574_vm0, %v572_v0  ;;  %576 = vst.msk [vmem:[#allocation2 + $0x8] sm:$0xff] (!%p2645_p0), %vm574_vm0, %v573_v1 }
  0x8a PF: > { %v3655_v2 = vld [vmem:[#allocation2] sm:$0xff]  ;;  %vm581_vm1 = vcmask 261120   ;;  %v3657_v3 = vld [vmem:[#allocation2 + $0x8] sm:$0xff]  ;;  %v623_v18 = vld [vmem:[%s3622_s28 + $0x10] sm:$0xff]  ;;  %v609_v22 = vlaneseq  ;;  %s4020_s2 = scalar_lea.vmem [#allocation7], %s3601_s20  ;;  %v3293_v46 = vmov 0.0  }
  0x8b   : > { %v582_v4 = vsel %vm581_vm1, %v3655_v2, 0.0  ;;  %v585_v5 = vsel %vm581_vm1, %v3657_v3, 0.0  ;;  %v621_v16 = vld [vmem:[%s3622_s28] sm:$0xff]  ;;  %v622_v17 = vld [vmem:[%s3622_s28 + $0x8] sm:$0xff]  ;;  %v624_v20 = vld [vmem:[%s3622_s28 + $0x18] sm:$0xff]  ;;  %2776 = vmatprep.subr.mxu0 %v3293_v46  ;;  %vm3294_vm2 = vmmov 0  }
  0x8c   : > { %583 = vadd.xlane.f32.xlu0 %v582_v4  ;;  %v2887_v19 = vpack.c.bf16 %v622_v17, %v621_v16  ;;  %v2891_v21 = vpack.c.bf16 %v624_v20, %v623_v18  ;;  %v610_v23 = vshrl.u32 %v609_v22, 7  ;;  %v579_v25 = vld [vmem:[%s4020_s2] sm:$0x3]  ;;  %2778 = vmatprep.mubr.msk.f32.mxu0 %vm3294_vm2, %v3293_v46  ;;  %s3295_s3 = smov 96   ;;  %vm709_vm3 = vcmask 64512   ;;  %s3296_s4 = smov 64  }
  0x8d   : > { %v580_v26 = vld [vmem:[%s3617_s27] sm:$0x3]  ;;  %s3297_s14 = smov 88   ;;  %s3298_s15 = smov 120   ;;  %vm1379_vm4 = vcmask 130112   ;;  %vm1722_vm5 = vcmask 195712  }
  0x8e   : > { %2888 = vmatprep.subr.bf16.mxu1 %v2887_v19  ;;  %v2192_v24 = vsub.s32 1, %v610_v23  ;;  %v611_v35 = vsub.s32 0, %v610_v23  ;;  %s3299_s18 = smov 56   ;;  %s3300_s23 = smov 80   ;;  %vm2065_vm6 = vcmask 261312   ;;  %vm2323_vm7 = vcmask 523264  }
  0x8f   : > { %2890 = vmatpush3.bf16.msra.mxu1 %v2887_v19  ;;  %s3301_s29 = smov 112   ;;  %s3302_s12 = smov 48  }
  0x90   : > { %586 = vadd.xlane.f32.xlu0 %v585_v5  ;;  %2892 = vmatprep.subr.bf16.mxu1 %v2891_v21  ;;  %v3674_v27 = vrot.slane %v579_v25, %v2192_v24  ;;  %v3676_v28 = vrot.slane %v580_v26, %v2192_v24  ;;  %v612_v36 = vrot.slane %v579_v25, %v611_v35  ;;  %s3303_s20 = smov 72   ;;  %s3304_s30 = smov 104  }
  0x91   : > { %v618_v39 = vrot.slane %v580_v26, %v611_v35  ;;  %s3305_s27 = smov 40   ;;  %s3306_s28 = smov 8  }
  0x92   : > { %s3307_s25 = smov 16   ;;  %s3308_s10 = smov 24  }
  0x93   : > { %2894 = vmatpush3.bf16.msra.mxu1 %v2891_v21  ;;  %p2683_p11 = scmp.ne.s32.totalorder %s3271_s19, 1 }
  0x94   : > { %2766 = vmatprep.subr.mxu1 %v3293_v46 }
 0x119   : > { %v584_v6 = vpop.xlane.xlu0 %583 }
 0x11a   : > { %v589_v7 = vmul.f32 0.03125, %v584_v6 }
 0x11c   : > { %v591_v8 = vsub.f32 %v3655_v2, %v589_v7 }
 0x11d   : > { %v587_v9 = vpop.xlane.xlu0 %586 }
 0x11e   : > { %v590_v10 = vmul.f32 0.03125, %v587_v9  ;;  %v593_v11 = vmul.f32 %v591_v8, %v591_v8 }
 0x120   : > { %v592_v12 = vsub.f32 %v3657_v3, %v590_v10  ;;  %v595_v13 = vsel %vm581_vm1, %v593_v11, 0.0 }
 0x121   : > { %596 = vadd.xlane.f32.xlu1 %v595_v13 }
 0x122   : > { %v594_v14 = vmul.f32 %v592_v12, %v592_v12 }
 0x124   : > { %v598_v15 = vsel %vm581_vm1, %v594_v14, 0.0 }
 0x125   : > { %599 = vadd.xlane.f32.xlu1 %v598_v15 }
 0x1ae   : > { %v597_v29 = vpop.xlane.xlu1 %596 }
 0x1af   : > { %v601_v30 = vmul.f32 0.03125, %v597_v29 }
 0x1b1   : > { %v603_v31 = vadd.f32 1e-05, %v601_v30 }
 0x1b2   : > { %v600_v32 = vpop.xlane.xlu1 %599 }
 0x1b3   : > { %3053 = vrsqrt.f32 %v603_v31  ;;  %v602_v33 = vmul.f32 0.03125, %v600_v32 }
 0x1b5   : > { %v604_v34 = vadd.f32 1e-05, %v602_v33 }
 0x1b7   : > { %3055 = vrsqrt.f32 %v604_v34 }
 0x1bd   : > { %v3054_v37 = vpop.eup %3053 }
 0x1be   : > { %v607_v38 = vmul.f32 %v3054_v37, %v591_v8 }
 0x1c0   : > { %v613_v40 = vmul.f32 %v612_v36, %v607_v38 }
 0x1c1   : > { %v3056_v41 = vpop.eup %3055 }
 0x1c2   : > { %v608_v42 = vmul.f32 %v3056_v41, %v592_v12  ;;  %v619_v43 = vadd.f32 %v618_v39, %v613_v40 }
 0x1c4   : > { %v614_v44 = vmul.f32 %v612_v36, %v608_v42  ;;  %2763 = vmatprep.mubr.msk.f32.mxu1 %vm581_vm1, %v619_v43 }
 0x1c6   : > { %v620_v45 = vadd.f32 %v618_v39, %v614_v44 }
 0x1c8   : > { %2764 = vmatmul.mubr.msk.f32.vlgmr.msra.gmra.mrb[0].mxu1 %vm581_vm1, %v620_v45 }
 0x1c9   : > { %2768 = vmatprep.mubr.msk.f32.mxu1 %vm3294_vm2, %v3293_v46 }
 0x29b   : > { %v3686_v47 = vpop.f32.mrb[0].mxu1 }
 0x29c   : > { %785 = vrot.lane.b32.xlu1 %v3686_v47, %s3295_s3  ;;  %v3689_v48 = vpop.f32.mrb[1].mxu1 }
 0x29d   : > { %707 = vrot.lane.b32.xlu0 %v3689_v48, %s3295_s3 }
 0x30e   : > { %v786_v50 = vpop.permute.xlu1 %785 }
 0x30f   : > { %v708_v49 = vpop.permute.xlu0 %707 }
 0x310   : > { %2767 = vmatpush3.xpose.msk.msra.mxu1 %vm709_vm3, %v708_v49 }
 0x311   : > { %2771 = vmatprep.subr.mxu1 %v3293_v46 }
 0x313   : > { %2769 = vmatmul.mubr.msk.f32.vlgmr.msra.gmra.mrb[2].mxu1 %vm709_vm3, %v3689_v48 }
 0x314   : > { %2772 = vmatpush3.xpose.msk.msra.mxu1 %vm709_vm3, %v786_v50  ;;  %2773 = vmatprep.mubr.msk.f32.mxu1 %vm3294_vm2, %v3293_v46 }
 0x315   : > { %2781 = vmatprep.subr.mxu1 %v3293_v46 }
 0x317   : > { %2774 = vmatmul.mubr.msk.f32.vlgmr.msra.gmra.mrb[4].mxu1 %vm709_vm3, %v3686_v47 }
 0x318   : > { %2783 = vmatprep.mubr.msk.f32.mxu1 %vm3294_vm2, %v3293_v46 }
 0x3e6   : > { %v780_v51 = vpop.f32.mrb[2].mxu1 }
 0x3e7   : > { %v861_v52 = vmul.f32 0.35355338, %v780_v51  ;;  %v2770_v53 = vpop.f32.mrb[3].mxu1 }
 0x3e9   : > { %v863_v54 = vsel %vm709_vm3, %v861_v52, -inf }
 0x3ea   : > { %864 = vmax.xlane.f32.xlu1 %v863_v54  ;;  %v857_v55 = vpop.f32.mrb[4].mxu1 }
 0x3eb   : > { %v862_v56 = vmul.f32 0.35355338, %v857_v55  ;;  %v2775_v57 = vpop.f32.mrb[5].mxu1 }
 0x3ed   : > { %v866_v58 = vsel %vm709_vm3, %v862_v56, -inf }
 0x3ee   : > { %867 = vmax.xlane.f32.xlu0 %v866_v58 }
 0x3fb   : > { %961 = vrot.lane.b32.xlu1 %v3686_v47, %s3296_s4 }
 0x3ff   : > { %1041 = vrot.lane.b32.xlu1 %v3689_v48, %s3297_s14 }
 0x403   : > { %1119 = vrot.lane.b32.xlu1 %v3686_v47, %s3297_s14 }
 0x404   : > { %885 = vrot.lane.b32.xlu0 %v3689_v48, %s3296_s4 }
 0x477   : > { %v865_v59 = vpop.xlane.xlu1 %864 }
 0x478   : > { %v869_v60 = vsub.f32 %v861_v52, %v865_v59 }
 0x47a   : > { %v871_v61 = vmul.f32 1.442695, %v869_v60 }
 0x47b   : > { %v962_v62 = vpop.permute.xlu1 %961  ;;  %v868_v63 = vpop.xlane.xlu0 %867 }
 0x47c   : > { %3057 = vpow2.f32 %v871_v61  ;;  %v870_v0 = vsub.f32 %v862_v56, %v868_v63  ;;  %2782 = vmatpush3.msra.mxu1 %v962_v62 }
 0x47d   : > { %2791 = vmatprep.subr.mxu1 %v3293_v46 }
 0x47e   : > { %v873_v1 = vmul.f32 1.442695, %v870_v0 }
 0x47f   : > { %v886_v4 = vpop.permute.xlu0 %885  ;;  %v1042_v9 = vpop.permute.xlu1 %1041 }
 0x480   : > { %3059 = vpow2.f32 %v873_v1  ;;  %2777 = vmatpush3.msra.mxu0 %v886_v4 }
 0x481   : > { %2786 = vmatprep.subr.mxu0 %v3293_v46 }
 0x483   : > { %v1120_v10 = vpop.permute.xlu1 %1119 }
 0x486   : > { %v3058_v5 = vpop.eup %3057 }
 0x487   : > { %v875_v6 = vsel %vm709_vm3, %v3058_v5, 0.0 }
 0x488   : > { %876 = vadd.xlane.f32.xlu0 %v875_v6 }
 0x48a   : > { %v3060_v7 = vpop.eup %3059 }
 0x48b   : > { %v878_v8 = vsel %vm709_vm3, %v3060_v7, 0.0 }
 0x48c   : > { %879 = vadd.xlane.f32.xlu1 %v878_v8 }
 0x49d   : > { %1117 = vrot.lane.b32.xlu1 %v3686_v47, %s3298_s15 }
 0x49e   : > { %1039 = vrot.lane.b32.xlu0 %v3689_v48, %s3298_s15 }
 0x515   : > { %v877_v11 = vpop.xlane.xlu0 %876 }
 0x516   : > { %3061 = vrcp.f32 %v877_v11 }
 0x519   : > { %v880_v12 = vpop.xlane.xlu1 %879  ;;  %v1040_v17 = vpop.permute.xlu0 %1039 }
 0x51a   : > { %3063 = vrcp.f32 %v880_v12 }
 0x51d   : > { %v1118_v18 = vpop.permute.xlu1 %1117 }
 0x520   : > { %v3062_v13 = vpop.eup %3061 }
 0x521   : > { %v882_v14 = vmul.f32 %v3062_v13, %v3058_v5 }
 0x523   : > { %2779 = vmatmul.mubr.msk.f32.vlgmr.msra.gmra.mrb[0].mxu0 %vm709_vm3, %v882_v14 }
 0x524   : > { %v3064_v15 = vpop.eup %3063  ;;  %2787 = vmatpush3.xpose.msk.msra.mxu0 %vm709_vm3, %v1042_v9  ;;  %2788 = vmatprep.mubr.msk.f32.mxu0 %vm3294_vm2, %v3293_v46 }
 0x525   : > { %v884_v16 = vmul.f32 %v3064_v15, %v3060_v7  ;;  %2796 = vmatprep.subr.mxu0 %v3293_v46 }
 0x527   : > { %2784 = vmatmul.mubr.msk.f32.vlgmr.msra.gmra.mrb[6].mxu1 %vm709_vm3, %v884_v16  ;;  %2789 = vmatmul.mubr.msk.f32.vlgmr.msra.gmra.mrb[2].mxu0 %vm709_vm3, %v1040_v17 }
 0x528   : > { %2792 = vmatpush3.xpose.msk.msra.mxu1 %vm709_vm3, %v1120_v10  ;;  %2793 = vmatprep.mubr.msk.f32.mxu1 %vm3294_vm2, %v3293_v46 }
 0x529   : > { %2801 = vmatprep.subr.mxu1 %v3293_v46  ;;  %2798 = vmatprep.mubr.msk.f32.mxu0 %vm3294_vm2, %v3293_v46 }
 0x52b   : > { %2794 = vmatmul.mubr.msk.f32.vlgmr.msra.gmra.mrb[8].mxu1 %vm709_vm3, %v1118_v18 }
 0x52c   : > { %2803 = vmatprep.mubr.msk.f32.mxu1 %vm3294_vm2, %v3293_v46 }
 0x5f6   : > { %v957_v19 = vpop.f32.mrb[0].mxu0 }
 0x5f7   : > { %1037 = vst.msk [vmem:[#allocation3] sm:$0xff] %vm709_vm3, %v957_v19  ;;  %v2780_v20 = vpop.f32.mrb[1].mxu0 }
 0x5fa   : > { %v1033_v21 = vpop.f32.mrb[6].mxu1  ;;  %v1113_v22 = vpop.f32.mrb[2].mxu0 }
 0x5fb   : > { %1038 = vst.msk [vmem:[#allocation3 + $0x8] sm:$0xff] %vm709_vm3, %v1033_v21  ;;  %v1195_v23 = vmul.f32 0.35355338, %v1113_v22  ;;  %v2785_v24 = vpop.f32.mrb[7].mxu1  ;;  %v2790_v25 = vpop.f32.mrb[3].mxu0 }
 0x5fd   : > { %v1197_v26 = vsel %vm709_vm3, %v1195_v23, -inf }
 0x5fe   : > { %1198 = vmax.xlane.f32.xlu0 %v1197_v26  ;;  %v1191_v29 = vpop.f32.mrb[8].mxu1 }
 0x5ff   : > { %v1196_v30 = vmul.f32 0.35355338, %v1191_v29  ;;  %v2795_v31 = vpop.f32.mrb[9].mxu1 }
 0x601   : > { %v1200_v32 = vsel %vm709_vm3, %v1196_v30, -inf }
 0x602   : > { %1201 = vmax.xlane.f32.xlu1 %v1200_v32 }
 0x613   : > { %1295 = vrot.lane.b32.xlu1 %v3686_v47, %s3299_s18 }
 0x614   : > { %1219 = vrot.lane.b32.xlu0 %v3689_v48, %s3299_s18 }
 0x617   : > { %1384 = vrot.lane.b32.xlu1 %v3689_v48, %s3300_s23 }
 0x61b   : > { %1462 = vrot.lane.b32.xlu1 %v3686_v47, %s3300_s23 }
 0x61f   : > { %1460 = vrot.lane.b32.xlu1 %v3686_v47, %s3301_s29 }
 0x68b   : > { %v1199_v33 = vpop.xlane.xlu0 %1198 }
 0x68c   : > { %v1203_v34 = vsub.f32 %v1195_v23, %v1199_v33 }
 0x68e   : > { %v1205_v35 = vmul.f32 1.442695, %v1203_v34 }
 0x68f   : > { %v1220_v36 = vpop.permute.xlu0 %1219  ;;  %v1202_v37 = vpop.xlane.xlu1 %1201 }
 0x690   : > { %3065 = vpow2.f32 %v1205_v35  ;;  %v1204_v38 = vsub.f32 %v1196_v30, %v1202_v37  ;;  %2797 = vmatpush3.msra.mxu0 %v1220_v36 }
 0x691   : > { %2806 = vmatprep.subr.mxu0 %v3293_v46 }
 0x692   : > { %v1207_v39 = vmul.f32 1.442695, %v1204_v38 }
 0x693   : > { %v1296_v40 = vpop.permute.xlu1 %1295 }
 0x694   : > { %3067 = vpow2.f32 %v1207_v39  ;;  %2802 = vmatpush3.msra.mxu1 %v1296_v40 }
 0x695   : > { %2811 = vmatprep.subr.mxu1 %v3293_v46 }
 0x697   : > { %v1385_v50 = vpop.permute.xlu1 %1384 }
 0x69a   : > { %v3066_v41 = vpop.eup %3065 }
 0x69b   : > { %v1209_v42 = vsel %vm709_vm3, %v3066_v41, 0.0  ;;  %v1463_v54 = vpop.permute.xlu1 %1462 }
 0x69c   : > { %1210 = vadd.xlane.f32.xlu0 %v1209_v42 }
 0x69e   : > { %v3068_v43 = vpop.eup %3067 }
 0x69f   : > { %v1212_v44 = vsel %vm709_vm3, %v3068_v43, 0.0  ;;  %v1461_v57 = vpop.permute.xlu1 %1460 }
 0x6a0   : > { %1213 = vadd.xlane.f32.xlu0 %v1212_v44 }
 0x6b6   : > { %1382 = vrot.lane.b32.xlu0 %v3689_v48, %s3301_s29 }
 0x729   : > { %v1211_v45 = vpop.xlane.xlu0 %1210 }
 0x72a   : > { %3069 = vrcp.f32 %v1211_v45 }
 0x72d   : > { %v1214_v49 = vpop.xlane.xlu0 %1213 }
 0x72e   : > { %3071 = vrcp.f32 %v1214_v49 }
 0x731   : > { %v1383_v56 = vpop.permute.xlu0 %1382 }
 0x734   : > { %v3070_v51 = vpop.eup %3069 }
 0x735   : > { %v1216_v52 = vmul.f32 %v3070_v51, %v3066_v41 }
 0x737   : > { %2799 = vmatmul.mubr.msk.f32.vlgmr.msra.gmra.mrb[4].mxu0 %vm709_vm3, %v1216_v52 }
 0x738   : > { %v3072_v53 = vpop.eup %3071  ;;  %2807 = vmatpush3.xpose.msk.msra.mxu0 %vm709_vm3, %v1385_v50  ;;  %2808 = vmatprep.mubr.msk.f32.mxu0 %vm3294_vm2, %v3293_v46 }
 0x739   : > { %v1218_v55 = vmul.f32 %v3072_v53, %v3068_v43  ;;  %2816 = vmatprep.subr.mxu0 %v3293_v46 }
 0x73b   : > { %2804 = vmatmul.mubr.msk.f32.vlgmr.msra.gmra.mrb[10].mxu1 %vm709_vm3, %v1218_v55  ;;  %2809 = vmatmul.mubr.msk.f32.vlgmr.msra.gmra.mrb[6].mxu0 %vm709_vm3, %v1383_v56 }
 0x73c   : > { %2812 = vmatpush3.xpose.msk.msra.mxu1 %vm709_vm3, %v1463_v54  ;;  %2813 = vmatprep.mubr.msk.f32.mxu1 %vm3294_vm2, %v3293_v46 }
 0x73d   : > { %2821 = vmatprep.subr.mxu1 %v3293_v46  ;;  %2818 = vmatprep.mubr.msk.f32.mxu0 %vm3294_vm2, %v3293_v46 }
 0x73f   : > { %2814 = vmatmul.mubr.msk.f32.vlgmr.msra.gmra.mrb[12].mxu1 %vm709_vm3, %v1461_v57 }
 0x740   : > { %2823 = vmatprep.mubr.msk.f32.mxu1 %vm3294_vm2, %v3293_v46 }
 0x80a   : > { %v3762_v58 = vpop.f32.mrb[4].mxu0 }
 0x80b   : > { %v2800_v59 = vpop.f32.mrb[5].mxu0 }
 0x80e   : > { %v3764_v60 = vpop.f32.mrb[10].mxu1  ;;  %v1456_v61 = vpop.f32.mrb[6].mxu0 }
 0x80f   : > { %v1538_v62 = vmul.f32 0.35355338, %v1456_v61  ;;  %v2805_v63 = vpop.f32.mrb[11].mxu1  ;;  %v2810_v0 = vpop.f32.mrb[7].mxu0 }
 0x811   : > { %v1540_v1 = vsel %vm709_vm3, %v1538_v62, -inf }
 0x812   : > { %1541 = vmax.xlane.f32.xlu0 %v1540_v1  ;;  %v1534_v4 = vpop.f32.mrb[12].mxu1 }
 0x813   : > { %v1539_v5 = vmul.f32 0.35355338, %v1534_v4  ;;  %v2815_v6 = vpop.f32.mrb[13].mxu1  ;;  %v2070_v4 = vld [vmem:[%s3627_s16] sm:$0xff] }
 0x815   : > { %v1543_v7 = vsel %vm709_vm3, %v1539_v5, -inf }
 0x816   : > { %1544 = vmax.xlane.f32.xlu1 %v1543_v7  ;;  %v2072_v7 = vld [vmem:[%s3627_s16 + $0x10] sm:$0xff] }
 0x827   : > { %1638 = vrot.lane.b32.xlu1 %v3686_v47, %s3302_s12 }
 0x828   : > { %1562 = vrot.lane.b32.xlu0 %v3689_v48, %s3302_s12 }
 0x82b   : > { %1727 = vrot.lane.b32.xlu1 %v3689_v48, %s3303_s20 }
 0x82f   : > { %1805 = vrot.lane.b32.xlu1 %v3686_v47, %s3303_s20 }
 0x833   : > { %1803 = vrot.lane.b32.xlu1 %v3686_v47, %s3304_s30 }
 0x89f   : > { %v1542_v8 = vpop.xlane.xlu0 %1541 }
 0x8a0   : > { %v1546_v9 = vsub.f32 %v1538_v62, %v1542_v8  ;;  %v2073_v8 = vld [vmem:[%s3627_s16 + $0x18] sm:$0xff] }
 0x8a2   : > { %v1548_v10 = vmul.f32 1.442695, %v1546_v9  ;;  %v2899_v9 = vpack.c.bf16 %v2073_v8, %v2072_v7 }
 0x8a3   : > { %v1563_v11 = vpop.permute.xlu0 %1562  ;;  %v1545_v12 = vpop.xlane.xlu1 %1544 }
 0x8a4   : > { %3073 = vpow2.f32 %v1548_v10  ;;  %v1547_v13 = vsub.f32 %v1539_v5, %v1545_v12  ;;  %2817 = vmatpush3.msra.mxu0 %v1563_v11  ;;  %v2071_v5 = vld [vmem:[%s3627_s16 + $0x8] sm:$0xff] }
 0x8a5   : > { %2826 = vmatprep.subr.mxu0 %v3293_v46  ;;  %v2895_v6 = vpack.c.bf16 %v2071_v5, %v2070_v4  ;;  %v2675_v5 = vld [vmem:[%s558_s0] ss:$0 sm:$0xff] }
 0x8a6   : > { %v1550_v14 = vmul.f32 1.442695, %v1547_v13 }
 0x8a7   : > { %v1639_v15 = vpop.permute.xlu1 %1638 }
 0x8a8   : > { %3075 = vpow2.f32 %v1550_v14  ;;  %2822 = vmatpush3.msra.mxu1 %v1639_v15 }
 0x8a9   : > { %2831 = vmatprep.subr.mxu1 %v3293_v46 }
 0x8ab   : > { %v1728_v22 = vpop.permute.xlu1 %1727 }
 0x8ae   : > { %v3074_v16 = vpop.eup %3073 }
 0x8af   : > { %v1552_v17 = vsel %vm709_vm3, %v3074_v16, 0.0  ;;  %v1806_v26 = vpop.permute.xlu1 %1805 }
 0x8b0   : > { %1553 = vadd.xlane.f32.xlu0 %v1552_v17 }
 0x8b2   : > { %v3076_v18 = vpop.eup %3075 }
 0x8b3   : > { %v1555_v19 = vsel %vm709_vm3, %v3076_v18, 0.0  ;;  %v1804_v31 = vpop.permute.xlu1 %1803 }
 0x8b4   : > { %1556 = vadd.xlane.f32.xlu0 %v1555_v19 }
 0x8ca   : > { %1725 = vrot.lane.b32.xlu0 %v3689_v48, %s3304_s30 }
 0x93d   : > { %v1554_v20 = vpop.xlane.xlu0 %1553 }
 0x93e   : > { %3077 = vrcp.f32 %v1554_v20 }
 0x941   : > { %v1557_v21 = vpop.xlane.xlu0 %1556 }
 0x942   : > { %3079 = vrcp.f32 %v1557_v21 }
 0x945   : > { %v1726_v30 = vpop.permute.xlu0 %1725 }
 0x948   : > { %v3078_v23 = vpop.eup %3077 }
 0x949   : > { %v1559_v24 = vmul.f32 %v3078_v23, %v3074_v16 }
 0x94b   : > { %2819 = vmatmul.mubr.msk.f32.vlgmr.msra.gmra.mrb[8].mxu0 %vm709_vm3, %v1559_v24 }
 0x94c   : > { %v3080_v25 = vpop.eup %3079  ;;  %2827 = vmatpush3.xpose.msk.msra.mxu0 %vm709_vm3, %v1728_v22  ;;  %2828 = vmatprep.mubr.msk.f32.mxu0 %vm3294_vm2, %v3293_v46 }
 0x94d   : > { %v1561_v29 = vmul.f32 %v3080_v25, %v3076_v18  ;;  %2836 = vmatprep.subr.mxu0 %v3293_v46  ;;  %v2672_v18 = vld [vmem:[%s550_s17] ss:$0 sm:$0xff] }
 0x94f   : > { %2824 = vmatmul.mubr.msk.f32.vlgmr.msra.gmra.mrb[14].mxu1 %vm709_vm3, %v1561_v29  ;;  %2829 = vmatmul.mubr.msk.f32.vlgmr.msra.gmra.mrb[10].mxu0 %vm709_vm3, %v1726_v30 }
 0x950   : > { %2832 = vmatpush3.xpose.msk.msra.mxu1 %vm709_vm3, %v1806_v26  ;;  %2833 = vmatprep.mubr.msk.f32.mxu1 %vm3294_vm2, %v3293_v46 }
 0x951   : > { %2841 = vmatprep.subr.mxu1 %v3293_v46  ;;  %2838 = vmatprep.mubr.msk.f32.mxu0 %vm3294_vm2, %v3293_v46 }
 0x953   : > { %2834 = vmatmul.mubr.msk.f32.vlgmr.msra.gmra.mrb[16].mxu1 %vm709_vm3, %v1804_v31 }
 0x954   : > { %2843 = vmatprep.mubr.msk.f32.mxu1 %vm3294_vm2, %v3293_v46 }
 0xa1e   : > { %v1634_v32 = vpop.f32.mrb[8].mxu0 }
 0xa1f   : > { %v2820_v33 = vpop.f32.mrb[9].mxu0 }
 0xa22   : > { %v1710_v34 = vpop.f32.mrb[14].mxu1  ;;  %v1799_v35 = vpop.f32.mrb[10].mxu0 }
 0xa23   : > { %v1881_v36 = vmul.f32 0.35355338, %v1799_v35  ;;  %v2825_v37 = vpop.f32.mrb[15].mxu1  ;;  %v2830_v38 = vpop.f32.mrb[11].mxu0 }
 0xa24   : > { %v2202_v37 = vld [vmem:[%s3636_s26] sm:$0xff]  ;;  %v2203_v38 = vld [vmem:[%s3636_s26 + $0x8] sm:$0xff] }
 0xa25   : > { %v1883_v39 = vsel %vm709_vm3, %v1881_v36, -inf }
 0xa26   : > { %1884 = vmax.xlane.f32.xlu0 %v1883_v39  ;;  %v1877_v40 = vpop.f32.mrb[16].mxu1  ;;  %v2903_v39 = vpack.c.bf16 %v2203_v38, %v2202_v37 }
 0xa27   : > { %v1882_v41 = vmul.f32 0.35355338, %v1877_v40  ;;  %v2835_v42 = vpop.f32.mrb[17].mxu1  ;;  %v2204_v40 = vld [vmem:[%s3636_s26 + $0x10] sm:$0xff] }
 0xa29   : > { %v1886_v43 = vsel %vm709_vm3, %v1882_v41, -inf }
 0xa2a   : > { %1887 = vmax.xlane.f32.xlu1 %v1886_v43 }
 0xa3b   : > { %1981 = vrot.lane.b32.xlu1 %v3686_v47, %s3305_s27 }
 0xa3f   : > { %1373 = vrot.lane.b32.xlu1 %v3762_v58, %s3306_s28 }
 0xa43   : > { %1375 = vrot.lane.b32.xlu1 %v3764_v60, %s3306_s28 }
 0xa47   : > { %1718 = vrot.lane.b32.xlu1 %v1710_v34, %s3307_s25 }
 0xab3   : > { %v1885_v46 = vpop.xlane.xlu0 %1884 }
 0xab4   : > { %v1889_v44 = vsub.f32 %v1881_v36, %v1885_v46 }
 0xab6   : > { %v1891_v45 = vmul.f32 1.442695, %v1889_v44 }
 0xab7   : > { %v1888_v49 = vpop.xlane.xlu1 %1887 }
 0xab8   : > { %3081 = vpow2.f32 %v1891_v45  ;;  %v1890_v50 = vsub.f32 %v1882_v41, %v1888_v49  ;;  %v2205_v41 = vld [vmem:[%s3636_s26 + $0x18] sm:$0xff] }
 0xab9   : > { %v2907_v42 = vpack.c.bf16 %v2205_v41, %v2204_v40 }
 0xaba   : > { %v1893_v51 = vmul.f32 1.442695, %v1890_v50 }
 0xabb   : > { %v1982_v52 = vpop.permute.xlu1 %1981 }
 0xabc   : > { %3083 = vpow2.f32 %v1893_v51  ;;  %2842 = vmatpush3.msra.mxu1 %v1982_v52 }
 0xabd   : > { %2904 = vmatprep.subr.bf16.mxu1 %v2903_v39 }
 0xabf   : > { %v1374_v47 = vpop.permute.xlu1 %1373 }
 0xac0   : > { %1380 = vst.msk [vmem:[#allocation3] sm:$0xff] %vm1379_vm4, %v1374_v47 }
 0xac2   : > { %v3082_v53 = vpop.eup %3081 }
 0xac3   : > { %v1376_v54 = vpop.permute.xlu1 %1375  ;;  %v1895_v55 = vsel %vm709_vm3, %v3082_v53, 0.0 }
 0xac4   : > { %1381 = vst.msk [vmem:[#allocation3 + $0x8] sm:$0xff] %vm1379_vm4, %v1376_v54  ;;  %1896 = vadd.xlane.f32.xlu0 %v1895_v55 }
 0xac6   : > { %v3084_v56 = vpop.eup %3083 }
 0xac7   : > { %v1719_v57 = vpop.permute.xlu1 %1718  ;;  %v1898_v58 = vsel %vm709_vm3, %v3084_v56, 0.0 }
 0xac8   : > { %1724 = vst.msk [vmem:[#allocation3 + $0x8] sm:$0xff] %vm1722_vm5, %v1719_v57  ;;  %1899 = vadd.xlane.f32.xlu0 %v1898_v58  ;;  %v2308_v58 = vld [vmem:[%s3650_s13] sm:$0xff] }
 0xade   : > { %1905 = vrot.lane.b32.xlu0 %v3689_v48, %s3305_s27 }
 0xae2   : > { %1716 = vrot.lane.b32.xlu0 %v1634_v32, %s3307_s25 }
 0xb51   : > { %v1897_v59 = vpop.xlane.xlu0 %1896 }
 0xb52   : > { %3085 = vrcp.f32 %v1897_v59  ;;  %v2309_v59 = vld [vmem:[%s3650_s13 + $0x8] sm:$0xff] }
 0xb55   : > { %v1900_v60 = vpop.xlane.xlu0 %1899 }
 0xb56   : > { %3087 = vrcp.f32 %v1900_v60  ;;  %v2911_v60 = vpack.c.bf16 %v2309_v59, %v2308_v58 }
 0xb59   : > { %v1906_v61 = vpop.permute.xlu0 %1905 }
 0xb5a   : > { %2837 = vmatpush3.msra.mxu0 %v1906_v61  ;;  %v2310_v61 = vld [vmem:[%s3650_s13 + $0x10] sm:$0xff] }
 0xb5b   : > { %2896 = vmatprep.subr.bf16.mxu0 %v2895_v6 }
 0xb5c   : > { %v3086_v62 = vpop.eup %3085 }
 0xb5d   : > { %v1902_v63 = vmul.f32 %v3086_v62, %v3082_v53  ;;  %v1717_v0 = vpop.permute.xlu0 %1716  ;;  %v2311_v62 = vld [vmem:[%s3650_s13 + $0x18] sm:$0xff] }
 0xb5e   : > { %1723 = vst.msk [vmem:[#allocation3] sm:$0xff] %vm1722_vm5, %v1717_v0  ;;  %v2313_v0 = vld [vmem:[%s3650_s13 + $0x28] sm:$0xff] }
 0xb5f   : > { %2839 = vmatmul.mubr.msk.f32.vlgmr.msra.gmra.mrb[12].mxu0 %vm709_vm3, %v1902_v63  ;;  %v2915_v63 = vpack.c.bf16 %v2311_v62, %v2310_v61 }
 0xb60   : > { %v3088_v1 = vpop.eup %3087  ;;  %2898 = vmatpush3.bf16.msra.mxu0 %v2895_v6 }
 0xb61   : > { %v1904_v48 = vmul.f32 %v3088_v1, %v3084_v56  ;;  %2900 = vmatprep.subr.bf16.mxu0 %v2899_v9 }
 0xb63   : > { %2844 = vmatmul.mubr.msk.f32.vlgmr.msra.gmra.mrb[18].mxu1 %vm709_vm3, %v1904_v48  ;;  %v2315_v48 = vld [vmem:[%s3650_s13 + $0x38] sm:$0xff] }
 0xb64   : > { %2902 = vmatpush3.bf16.msra.mxu0 %v2899_v9  ;;  %2906 = vmatpush3.bf16.msra.mxu1 %v2903_v39 }
 0xb65   : > { %2908 = vmatprep.subr.bf16.mxu1 %v2907_v42  ;;  %2912 = vmatprep.subr.bf16.mxu0 %v2911_v60 }
 0xb68   : > { %2910 = vmatpush3.bf16.msra.mxu1 %v2907_v42 }
 0xc32   : > { %v1977_v10 = vpop.f32.mrb[12].mxu0 }
 0xc33   : > { %2059 = vrot.lane.b32.xlu0 %v1977_v10, %s3308_s10  ;;  %v2840_v11 = vpop.f32.mrb[13].mxu0 }
 0xc36   : > { %v2053_v12 = vpop.f32.mrb[18].mxu1 }
 0xc37   : > { %2061 = vrot.lane.b32.xlu1 %v2053_v12, %s3308_s10  ;;  %v2845_v13 = vpop.f32.mrb[19].mxu1 }
 0xca5   : > { %v2060_v14 = vpop.permute.xlu0 %2059 }
 0xca6   : > { %2066 = vst.msk [vmem:[#allocation3] sm:$0xff] %vm2065_vm6, %v2060_v14 }
 0xca9   : > { %v2062_v15 = vpop.permute.xlu1 %2061 }
 0xcaa   : > { %2067 = vst.msk [vmem:[#allocation3 + $0x8] sm:$0xff] %vm2065_vm6, %v2062_v15 }
 0xcad   : > { %v2068_v16 = vld [vmem:[#allocation3] sm:$0xff] }
 0xcae   : > { %2854 = vmatprep.mubr.msk.f32.mxu0 %vm581_vm1, %v2068_v16 }
 0xcb1   : > { %v2069_v17 = vld [vmem:[#allocation3 + $0x8] sm:$0xff] }
 0xcb2   : > { %2855 = vmatmul.mubr.msk.f32.vlgmr.msra.gmra.mrb[14].mxu0 %vm581_vm1, %v2069_v17 }
 0xcb3   : > { %2914 = vmatpush3.bf16.msra.mxu0 %v2911_v60 }
 0xcb4   : > { %2916 = vmatprep.subr.bf16.mxu0 %v2915_v63 }
 0xcb7   : > { %2918 = vmatpush3.bf16.msra.mxu0 %v2915_v63 }
 0xd85   : > { %v2856_v19 = vpop.f32.mrb[14].mxu0 }
 0xd86   : > { %v2159_v20 = vadd.f32 %v2856_v19, %v2672_v18  ;;  %v2153_v21 = vpop.f32.mrb[15].mxu0 }
 0xd87   : > { %v2154_v22 = vadd.f32 %v2672_v18, %v2153_v21 }
 0xd88   : > { %v3822_v23 = vadd.f32 %v2159_v20, %v3657_v3  ;;  %v2680_v20 = vld [vmem:[%s566_s22] ss:$0 sm:$0xff] }
 0xd89   : > { %v3825_v24 = vadd.f32 %v2154_v22, %v3655_v2 }
 0xd8a   : > { %v2167_v25 = vsel %vm581_vm1, %v3822_v23, 0.0 }
 0xd8b   : > { %2168 = vadd.xlane.f32.xlu1 %v2167_v25  ;;  %v2164_v26 = vsel %vm581_vm1, %v3825_v24, 0.0 }
 0xd8c   : > { %2165 = vadd.xlane.f32.xlu0 %v2164_v26 }
 0xe18   : > { %v2169_v29 = vpop.xlane.xlu1 %2168 }
 0xe19   : > { %v2171_v30 = vmul.f32 0.03125, %v2169_v29  ;;  %v2166_v31 = vpop.xlane.xlu0 %2165 }
 0xe1a   : > { %v2170_v3 = vmul.f32 0.03125, %v2166_v31 }
 0xe1b   : > { %v2173_v32 = vsub.f32 %v3822_v23, %v2171_v30 }
 0xe1c   : > { %v2172_v2 = vsub.f32 %v3825_v24, %v2170_v3 }
 0xe1d   : > { %v2175_v35 = vmul.f32 %v2173_v32, %v2173_v32 }
 0xe1e   : > { %v2174_v33 = vmul.f32 %v2172_v2, %v2172_v2 }
 0xe1f   : > { %v2179_v36 = vsel %vm581_vm1, %v2175_v35, 0.0 }
 0xe20   : > { %v2176_v34 = vsel %vm581_vm1, %v2174_v33, 0.0 }
 0xe21   : > { %2177 = vadd.xlane.f32.xlu0 %v2176_v34 }
 0xe25   : > { %2180 = vadd.xlane.f32.xlu0 %v2179_v36 }
 0xeae   : > { %v2178_v43 = vpop.xlane.xlu0 %2177 }
 0xeaf   : > { %v2182_v46 = vmul.f32 0.03125, %v2178_v43 }
 0xeb1   : > { %v2184_v44 = vadd.f32 1e-05, %v2182_v46 }
 0xeb2   : > { %v2181_v45 = vpop.xlane.xlu0 %2180 }
 0xeb3   : > { %3089 = vrsqrt.f32 %v2184_v44  ;;  %v2183_v49 = vmul.f32 0.03125, %v2181_v45 }
 0xeb5   : > { %v2185_v50 = vadd.f32 1e-05, %v2183_v49 }
 0xeb7   : > { %3091 = vrsqrt.f32 %v2185_v50 }
 0xebd   : > { %v3090_v51 = vpop.eup %3089 }
 0xebe   : > { %v2188_v52 = vmul.f32 %v3090_v51, %v2172_v2 }
 0xec0   : > { %v2194_v47 = vmul.f32 %v3674_v27, %v2188_v52 }
 0xec1   : > { %v3092_v53 = vpop.eup %3091 }
 0xec2   : > { %v2189_v54 = vmul.f32 %v3092_v53, %v2173_v32  ;;  %v2200_v55 = vadd.f32 %v3676_v28, %v2194_v47 }
 0xec4   : > { %v2195_v56 = vmul.f32 %v3674_v27, %v2189_v54  ;;  %2865 = vmatprep.mubr.msk.f32.mxu1 %vm581_vm1, %v2200_v55  ;;  %v2312_v27 = vld [vmem:[%s3650_s13 + $0x20] sm:$0xff] }
 0xec5   : > { %v2919_v1 = vpack.c.bf16 %v2313_v0, %v2312_v27 }
 0xec6   : > { %v2201_v57 = vadd.f32 %v3676_v28, %v2195_v56  ;;  %v2314_v28 = vld [vmem:[%s3650_s13 + $0x30] sm:$0xff] }
 0xec7   : > { %2920 = vmatprep.subr.bf16.mxu0 %v2919_v1  ;;  %v2923_v4 = vpack.c.bf16 %v2315_v48, %v2314_v28 }
 0xec8   : > { %2866 = vmatmul.mubr.msk.f32.vlgmr.msra.gmra.mrb[20].mxu1 %vm581_vm1, %v2201_v57  ;;  %2922 = vmatpush3.bf16.msra.mxu0 %v2919_v1 }
 0xec9   : > { %2924 = vmatprep.subr.bf16.mxu0 %v2923_v4 }
 0xecc   : > { %2926 = vmatpush3.bf16.msra.mxu0 %v2923_v4 }
 0xf9b   : > { %v2867_v6 = vpop.f32.mrb[20].mxu1 }
 0xf9c   : > { %v2291_v7 = vadd.f32 %v2867_v6, %v2675_v5  ;;  %v2285_v8 = vpop.f32.mrb[21].mxu1 }
 0xf9d   : > { %v2286_v9 = vadd.f32 %v2675_v5, %v2285_v8 }
 0xf9e   : > { %v2679_v10 = vmul.f32 -1.442695, %v2291_v7 }
 0xf9f   : > { %v2678_v11 = vmul.f32 -1.442695, %v2286_v9 }
 0xfa0   : > { %3093 = vpow2.f32 %v2679_v10 }
 0xfa1   : > { %3095 = vpow2.f32 %v2678_v11 }
 0xfaa   : > { %v3094_v12 = vpop.eup %3093 }
 0xfab   : > { %v3096_v13 = vpop.eup %3095  ;;  %v2301_v14 = vadd.f32 1.0, %v3094_v12 }
 0xfac   : > { %v2300_v15 = vadd.f32 1.0, %v3096_v13 }
 0xfad   : > { %3097 = vrcp.f32 %v2301_v14 }
 0xfae   : > { %3099 = vrcp.f32 %v2300_v15 }
 0xfb7   : > { %v3098_v16 = vpop.eup %3097 }
 0xfb8   : > { %v3100_v17 = vpop.eup %3099  ;;  %v2307_v19 = vmul.f32 %v3098_v16, %v2291_v7 }
 0xfb9   : > { %v2306_v18 = vmul.f32 %v3100_v17, %v2286_v9 }
 0xfbb   : > { %2884 = vmatprep.mubr.msk.f32.mxu0 %vm2323_vm7, %v2306_v18 }
 0xfbc   : > { %2885 = vmatmul.mubr.msk.f32.vlgmr.msra.gmra.mrb[16].mxu0 %vm2323_vm7, %v2307_v19 }
0x108f   : > { %v2886_v21 = vpop.f32.mrb[16].mxu0  ;;  %2412 = sbr.rel (%p2683_p11) target bundleno = 4246 (0x1096), region = 76 }
0x1090   : > { %v2402_v22 = vadd.f32 %v2886_v21, %v2680_v20  ;;  %v2396_v25 = vpop.f32.mrb[17].mxu0 }
0x1091   : > { %v2397_v26 = vadd.f32 %v2680_v20, %v2396_v25 }
0x1092   : > { %v2406_v29 = vadd.f32 %v2402_v22, %v3822_v23 }
0x1093   : > { %v2405_v30 = vadd.f32 %v2397_v26, %v3825_v24 }
0x1094   : > { %2408 = vst.msk [vmem:[#allocation2 + $0x8] sm:$0xff] %vm581_vm1, %v2406_v29  ;;  %2414 = vst.msk [vmem:[%s3652_s1 + $0x8] sm:$0xff] (!%p2683_p11), %vm581_vm1, %v2406_v29 }
0x1095   : > { %2407 = vst.msk [vmem:[#allocation2] sm:$0xff] %vm581_vm1, %v2405_v30  ;;  %2413 = vst.msk [vmem:[%s3652_s1] sm:$0xff] (!%p2683_p11), %vm581_vm1, %v2405_v30 }
0x1096 PF: > { %s4021_s11 = sld [smem:[#allocation18_spill]]  ;;  %s4022_s22 = sld [smem:[#allocation27_spill]] }
0x1097   : > { %s4023_s4 = sld [smem:[#allocation34_spill]]  ;;  %s2429_s15 = sshll.u32 %s3652_s1, 4  ;;  %s3879_s15 = int_to_ptr.vmem [resolvable:$true] %s2429_s15 }
0x1098   : > { %s2416_s19 = scalar_lea.sflag [#allocation6], %s3592_s21  ;;  %s3161_s18 = scalar_lea.vmem %s3879_s15, 256 }
0x1099   : > { %p3162_p8 = scmp.ne.s32.totalorder %s3879_s15, %s3161_s18  ;;  %s3309_s23 = smov [#allocation9]  }
0x109a   : > { %s3165_s29 = sshll.u32 %s3309_s23, 4  ;;  %s3166_s29 = int_to_ptr.vmem [resolvable:$false] %s3165_s29 }
0x109b   : > { %s3167_s12 = scalar_lea.vmem %s3166_s29, 512  ;;  %p3168_p10 = scmp.lt.s32.totalorder %s3879_s15, %s3166_s29 }
0x109c   : > { %s2694_s24 = sshll.u32 %s4021_s11, 8  ;;  %p4024_p12 = scmp.ne.s32.totalorder %s4022_s22, 0 }
0x109d   : > { %s3876_s14 = scalar_lea.hbm %s4023_s4, %s2694_s24  ;;  %p3169_p3 = scmp.lt.s32.totalorder %s3167_s12, %s3161_s18 }
0x109e   : > { %p3163_p1 = pnand %p3162_p8, %p4024_p12 }
0x109f   : > { %p3170_p13 = por %p3169_p3, %p3168_p10 }
0x10a0   : > { %p3164_p9 = pneg %p3163_p1 }
0x10a2   : > { %p3171_p6 = pnand %p3170_p13, %p3164_p9 }
0x10a4   : > { %3174 = shalt.err (!%p3171_p6)
}
0x10a5   : > { %s3175_s1 = scalar_lea.hbm %s3876_s14, 256  ;;  %s3179_s27 = scalar_lea.hbm %s4023_s4, 512 }
0x10a6   : > { %p3176_p7 = scmp.ne.s32.totalorder %s3876_s14, %s3175_s1  ;;  %p3180_p4 = scmp.lt.u32.totalorder %s3876_s14, %s4023_s4 }
0x10a7   : > { %p3181_p0 = scmp.lt.u32.totalorder %s3179_s27, %s3175_s1  ;;  %p3183_p8 = scmp.lt.u32.totalorder %s3175_s1, %s3876_s14 }
0x10a8   : > { %p3177_p5 = pnand %p3176_p7, %p4024_p12 }
0x10a9   : > { %p3182_p11 = por %p3181_p0, %p3180_p4 }
0x10aa   : > { %p3178_p2 = pneg %p3177_p5 }
0x10ab   : > { %p3184_p1 = por %p3183_p8, %p3182_p11 }
0x10ad   : > { %p3185_p9 = pnand %p3184_p1, %p3178_p2 }
0x10af   : > { %3188 = shalt.err (!%p3185_p9)
}
0x10b0   : > { %s3310_s16 = smov 128  }
0x10b1   : > { %2931 = dma.vmem_to_hbm [thread:$0]  (%p4024_p12), %s3879_s15, 256, %s3876_s14, %s2416_s19, %s3310_s16, %s3310_s16, %s3306_s28  }
0x10b2 PF: > { %s4025_s8 = sld [smem:[#allocation21_spill]]  ;;  %s4026_s17 = sld [smem:[#allocation15_spill]] }
0x10b3   : > { %s4027_s26 = sld [smem:[#allocation22_spill]] }
0x10b8   : > { %p2945_p10 = scmp.ge.s32.totalorder %s4025_s8, 2  ;;  %s2444_s13 = sand.u32 1, %s4026_s17  }
0x10b9   : > { %p4028_p3 = scmp.ne.s32.totalorder %s4027_s26, 0  ;;  %s2445_s0 = scalar_lea.sflag [#allocation6], %s2444_s13 }
0x10bb   : > { %p2941_p13 = pnand %p2945_p10, %p4028_p3 }
0x10bd   : > { %3242 = dma.done.wait (!%p2941_p13), %s2445_s0, 256  }
0x10be   : > { %3244 = vsyncadd (!%p2941_p13), %s2445_s0, 4294967040  ;;  %s29_s23 = sadd.s32 1, %s4025_s8   ;;  %s4029_s13 = sld [smem:[#allocation13_spill]] }
0x10bf   : > { %p26_p6 = scmp.ge.s32.totalorder %s29_s23, 6   ;;  %s4030_s14 = sld [smem:[#allocation14_spill]] }
0x10c0   : > { %s4031_s15 = sld [smem:[#allocation25_spill]]  ;;  %s4032_s16 = sld [smem:[#allocation16_spill]] }
0x10c1   : > { %s4033_s17 = sld [smem:[#allocation17_spill]]  ;;  %s4034_s18 = sld [smem:[#allocation26_spill]] }
0x10c2   : > { %s4035_s19 = sld [smem:[#allocation19_spill]]  ;;  %s4036_s20 = sld [smem:[#allocation20_spill]] }
0x10c3   : > { %s4037_s21 = sld [smem:[#allocation23_spill]]  ;;  %s4038_s22 = sld [smem:[#allocation24_spill]] }
0x10c4   :  { %28 = sbr.rel (!%p26_p6) target bundleno = 19 (0x13), region = 150 }
0x10cb   :  { %2450 = vsyncpa [#allocation5], 1 }
0x10cc   :  { %2452 = vsyncpa [#allocation5 + $0x1], 1 }
0x10cd   :  { %2453 = vsyncpa [#allocation8], 1 }
0x10ce   :  { %2455 = vsyncpa [#allocation8 + $0x1], 1 }
0x10cf   :  { %2456 = vsyncpa [#allocation6], 1 }
0x10d0   :  { %2458 = vsyncpa [#allocation6 + $0x1], 1 }

</bundles_post_ra>
